<compile_context>
chip_gen: v6e
topology: v6e:2x2x1
jax: 0.10.0
libtpu: 0.0.40
codegen_flags: <defaults>
</compile_context>

<pallas_src>
import math
import functools

import jax
import jax.numpy as jnp
from jax import lax
from jax.experimental import pallas as pl
from jax.experimental.pallas import tpu as pltpu


_VMEM_LIMIT = 64 * 1024 * 1024   # above the 16 MiB (v5e) / 32 MiB scoped defaults


def _const_spec(shape):
    """BlockSpec for an operand identical across all grid steps (constant index map).

    Requests single buffering (pl.Buffered(1)): the data is fetched once and reused,
    so a second pipeline buffer would only waste VMEM.  Falls back cleanly on JAX
    versions without the pipeline_mode knob.
    """
    index_map = lambda i: (0,) * len(shape)
    try:
        return pl.BlockSpec(shape, index_map, pipeline_mode=pl.Buffered(1))
    except (TypeError, AttributeError):
        return pl.BlockSpec(shape, index_map)


def _pick_row_tile(C, max_tile):
    """Largest row tile <= max_tile dividing C; prefer >=2 tiles with 128-aligned width
    so v7x's two TensorCores can split the 'parallel' axis and output column blocks stay
    lane-dense.  Falls back to a single full tile when C does not split cleanly."""
    if C > max_tile and C % max_tile == 0:
        return max_tile
    if C % 256 == 0:
        return min(max_tile, C // 2)
    # TODO(synk): ragged/padded tiling for C not divisible by the tile is not implemented.
    return C


# ----------------------------------------------------------------------------
# Stage 0: K/V projections — computed ONCE (hoisted out of the query-tile loop).
# ----------------------------------------------------------------------------
def _kv_proj_kernel(k_ref, v_ref, wk_ref, wv_ref, ko_ref, vo_ref):
    ko_ref[...] = jnp.dot(k_ref[...], wk_ref[...],
                          preferred_element_type=jnp.float32).astype(ko_ref.dtype)
    vo_ref[...] = jnp.dot(v_ref[...], wv_ref[...],
                          preferred_element_type=jnp.float32).astype(vo_ref.dtype)


# ----------------------------------------------------------------------------
# Stage 1: Q projection + per-head scaled-dot-product attention over a query-row tile.
# Output is the (G, tq) TRANSPOSED column block of a (G, C) intermediate: row h*hd + d
# holds head h / dim d across tokens, so reshape(C, G) outside the kernel reproduces the
# module's (H, C, hd).transpose(1, 2).reshape(C, G) exactly and for free.
# ----------------------------------------------------------------------------
def _make_attn_kernel(num_heads: int):
    def kernel(x_ref, kp_ref, vp_ref, wq_ref, ot_ref):
        tq, G = x_ref.shape
        H = num_heads
        hd = G // H

        # Q projection for this query tile; softmax 1/sqrt(hd) is pre-folded into Wq.
        q_lin = jnp.dot(x_ref[...], wq_ref[...], preferred_element_type=jnp.float32)

        aligned = (hd % 8) == 0
        head_outs_t = []
        for h in range(H):
            sl = slice(h * hd, (h + 1) * hd)
            q_h = q_lin[:, sl].astype(jnp.bfloat16)   # (tq, hd)
            k_h = kp_ref[:, sl]                       # (Ck, hd) bf16, pre-projected
            v_h = vp_ref[:, sl]                       # (Ck, hd) bf16, pre-projected

            # scores = q_h @ k_h.T (scale already folded into Wq)
            s = lax.dot_general(q_h, k_h, (((1,), (1,)), ((), ())),
                                preferred_element_type=jnp.float32)   # (tq, Ck)

            # Numerically stable softmax in f32; reciprocal on the (otherwise idle) EUP.
            m = jnp.max(s, axis=-1, keepdims=True)
            e = jnp.exp(s - m)
            denom = jnp.sum(e, axis=-1, keepdims=True)
            p = (e * pl.reciprocal(denom, approx=True)).astype(jnp.bfloat16)

            # PV product emitted ALREADY TRANSPOSED by the MXU: (hd, tq) = v_h^T @ p^T.
            o_h_t = lax.dot_general(v_h, p, (((0,), (1,)), ((), ())),
                                    preferred_element_type=jnp.float32)
            if aligned:
                ot_ref[sl, :] = o_h_t.astype(ot_ref.dtype)   # aligned sublane block
            else:
                head_outs_t.append(o_h_t)

        if not aligned:
            ot_ref[...] = jnp.concatenate(head_outs_t, axis=0).astype(ot_ref.dtype)

    return kernel


# ----------------------------------------------------------------------------
# Stage 2: final projection  y = out2d @ Wp^T + bp  (row-tiled GEMM + bias).
# TODO(synk): when grid == (1,) this could be fused into stage 1 to skip the HBM
# intermediate, but that needs an in-kernel (G, C)->(C, G) relayout of the scrambled
# layout; kept as a separate bf16-fed call for robustness.
# ----------------------------------------------------------------------------
def _proj_kernel(xin_ref, wp_ref, bp_ref, o_ref):
    y = jnp.dot(xin_ref[...], wp_ref[...], preferred_element_type=jnp.float32)
    o_ref[...] = (y + bp_ref[...]).astype(o_ref.dtype)


# ----------------------------------------------------------------------------
# One-time parameter preparation (call once at setup, NOT per forward pass).
# ----------------------------------------------------------------------------
def prepare_cross_attention_params(wq, wk, wv, wp, bp, *, num_heads,
                                   mxu_dtype=jnp.bfloat16):
    G = wq.shape[0]
    assert G % num_heads == 0
    scale = (G // num_heads) ** (-0.5)
    return {
        "wq_t": (jnp.transpose(wq) * scale).astype(mxu_dtype),  # scale folded into Wq
        "wk_t": jnp.transpose(wk).astype(mxu_dtype),
        "wv_t": jnp.transpose(wv).astype(mxu_dtype),
        "wp_t": jnp.transpose(wp).astype(mxu_dtype),
        "bp": bp.reshape(1, G).astype(jnp.float32),
    }


def cross_attention_pallas(x, k, v, params, *, num_heads, q_tile=512):
    """x, k, v: (C, G) float32.  params: output of prepare_cross_attention_params."""
    C, G = x.shape
    assert k.shape == (C, G) and v.shape == (C, G)   # module requires matching shapes
    assert G % num_heads == 0

    wq_t, wk_t, wv_t = params["wq_t"], params["wk_t"], params["wv_t"]
    wp_t, bp = params["wp_t"], params["bp"]
    wbytes = jnp.dtype(wq_t.dtype).itemsize

    # Ship activations as bf16 once (kernels use bf16 MXU operands, f32 accumulation).
    x_bf = x.astype(jnp.bfloat16)
    k_bf = k.astype(jnp.bfloat16)
    v_bf = v.astype(jnp.bfloat16)

    cparams = pltpu.CompilerParams(dimension_semantics=("parallel",),
                                   vmem_limit_bytes=_VMEM_LIMIT)

    # ---- Stage 0: K/V projections (once, hoisted out of the query-tile loop) --------
    tkv = _pick_row_tile(C, q_tile)
    assert C % tkv == 0
    kv_cost = pl.CostEstimate(
        flops=2 * 2 * C * G * G,
        transcendentals=0,
        bytes_accessed=2 * C * G * 2 + 2 * G * G * wbytes + 2 * C * G * 2,
    )
    k_proj, v_proj = pl.pallas_call(
        _kv_proj_kernel,
        out_shape=(jax.ShapeDtypeStruct((C, G), jnp.bfloat16),
                   jax.ShapeDtypeStruct((C, G), jnp.bfloat16)),
        grid=(C // tkv,),
        in_specs=[
            pl.BlockSpec((tkv, G), lambda i: (i, 0)),   # k rows: streamed
            pl.BlockSpec((tkv, G), lambda i: (i, 0)),   # v rows: streamed
            _const_spec((G, G)),                        # Wk^T (bf16): resident, 1-buffered
            _const_spec((G, G)),                        # Wv^T (bf16): resident, 1-buffered
        ],
        out_specs=(pl.BlockSpec((tkv, G), lambda i: (i, 0)),
                   pl.BlockSpec((tkv, G), lambda i: (i, 0))),
        compiler_params=cparams,
        cost_estimate=kv_cost,
    )(k_bf, v_bf, wk_t, wv_t)

    # ---- Stage 1: attention over query-row tiles ("parallel" -> v7x megacore) -------
    tq = _pick_row_tile(C, q_tile)
    assert C % tq == 0
    n_q = C // tq
    attn_cost = pl.CostEstimate(
        flops=2 * C * G * G + 4 * C * C * G,             # Q proj + QK^T + PV (K/V hoisted)
        transcendentals=num_heads * C * C,               # exp on the score tiles
        bytes_accessed=(C * G * 2                        # x (bf16)
                        + 2 * C * G * 2                  # projected K/V (bf16, single-fetch)
                        + G * G * wbytes                 # Wq^T * scale
                        + G * C * 2),                    # (G, C) bf16 intermediate
    )
    out_t = pl.pallas_call(
        _make_attn_kernel(num_heads),
        out_shape=jax.ShapeDtypeStruct((G, C), jnp.bfloat16),
        grid=(n_q,),
        in_specs=[
            pl.BlockSpec((tq, G), lambda i: (i, 0)),   # x: streamed per query tile
            _const_spec((C, G)),                       # projected K (bf16): resident
            _const_spec((C, G)),                       # projected V (bf16): resident
            _const_spec((G, G)),                       # Wq^T * scale (bf16): resident
        ],
        out_specs=pl.BlockSpec((G, tq), lambda i: (0, i)),   # transposed column block
        compiler_params=cparams,
        cost_estimate=attn_cost,
    )(x_bf, k_proj, v_proj, wq_t)

    # Module's (H, C, hd).transpose(1, 2).reshape(C, G): on the (G, C) intermediate this
    # is a row-major metadata reshape -> free in HBM.
    out2d = out_t.reshape(C, G)

    # ---- Stage 2: final projection y = out2d @ Wp^T + bp ----------------------------
    tm = _pick_row_tile(C, q_tile)
    proj_cost = pl.CostEstimate(
        flops=2 * C * G * G,
        transcendentals=0,
        bytes_accessed=C * G * 2 + G * G * wbytes + G * 4 + C * G * 4,
    )
    y = pl.pallas_call(
        _proj_kernel,
        out_shape=jax.ShapeDtypeStruct((C, G), jnp.float32),
        grid=(C // tm,),
        in_specs=[
            pl.BlockSpec((tm, G), lambda i: (i, 0)),   # scrambled attention rows (bf16)
            _const_spec((G, G)),                       # Wp^T (bf16): resident
            _const_spec((1, G)),                       # bias (f32): resident
        ],
        out_specs=pl.BlockSpec((tm, G), lambda i: (i, 0)),
        compiler_params=cparams,
        cost_estimate=proj_cost,
    )(out2d, wp_t, bp)
    return y


# ----------------------------------------------------------------------------
# Pure-JAX f32 reference (faithful transcription of the PyTorch forward).
# ----------------------------------------------------------------------------
def cross_attention_reference(x, k, v, wq, wk, wv, wp, bp, *, num_heads):
    C, G = x.shape
    H = num_heads
    hd = G // H
    scale = hd ** (-0.5)

    q_lin = x @ wq.T
    k_lin = k @ wk.T
    v_lin = v @ wv.T

    qkv = jnp.concatenate([q_lin, k_lin, v_lin], axis=-1)
    qkv = qkv.reshape(C, 3, H, hd).transpose(1, 2, 0, 3)   # (3, H, C, hd)
    q, kk, vv = qkv[0], qkv[1], qkv[2]

    attn = jnp.einsum("hcd,hed->hce", q, kk) * scale
    attn = jax.nn.softmax(attn, axis=-1)
    out = jnp.einsum("hce,hed->hcd", attn, vv)             # (H, C, hd)
    out = out.transpose(0, 2, 1).reshape(C, G)             # .transpose(1,2).reshape(C, G)
    return out @ wp.T + bp


if __name__ == "__main__":
    # Small shapes consistent with the module: x, k, v are (C, G), G % num_heads == 0.
    C, G = 16, 64
    NUM_HEADS = 8  # head_dim = 8 -> aligned sublane stores for the transposed head path

    key = jax.random.PRNGKey(0)
    ks = jax.random.split(key, 8)

    x = jax.random.normal(ks[0], (C, G), dtype=jnp.float32)
    k = jax.random.normal(ks[1], (C, G), dtype=jnp.float32)
    v = jax.random.normal(ks[2], (C, G), dtype=jnp.float32)

    wscale = 1.0 / math.sqrt(G)
    wq = jax.random.uniform(ks[3], (G, G), jnp.float32, -wscale, wscale)
    wk = jax.random.uniform(ks[4], (G, G), jnp.float32, -wscale, wscale)
    wv = jax.random.uniform(ks[5], (G, G), jnp.float32, -wscale, wscale)
    wp = jax.random.uniform(ks[6], (G, G), jnp.float32, -wscale, wscale)
    bp = jax.random.uniform(ks[7], (G,), jnp.float32, -wscale, wscale)

    # One-time parameter prep (transpose / fold scale / bf16) -- outside the hot path.
    params = prepare_cross_attention_params(wq, wk, wv, wp, bp, num_heads=NUM_HEADS)

    fwd = jax.jit(functools.partial(cross_attention_pallas, num_heads=NUM_HEADS))
    out = jax.block_until_ready(fwd(x, k, v, params))

    ref = cross_attention_reference(x, k, v, wq, wk, wv, wp, bp, num_heads=NUM_HEADS)
    # bf16 activations/weights/intermediate (f32 accumulation) + approx reciprocal
    # => relaxed tolerance vs. the all-f32 reference.
    err = jnp.max(jnp.abs(out - ref))
    assert jnp.allclose(out, ref, atol=5e-2, rtol=5e-2), f"mismatch: max abs err {err}"

    print("KERNEL_OK")
</pallas_src>

<mosaic_0001>
module attributes {stable_mosaic.version = 11 : i64} {
  func.func @_kv_proj_kernel(%arg0: i32, %arg1: memref<16x64xbf16, #tpu.memory_space<vmem>>, %arg2: memref<16x64xbf16, #tpu.memory_space<vmem>>, %arg3: memref<64x64xbf16, #tpu.memory_space<vmem>>, %arg4: memref<64x64xbf16, #tpu.memory_space<vmem>>, %arg5: memref<16x64xbf16, #tpu.memory_space<vmem>>, %arg6: memref<16x64xbf16, #tpu.memory_space<vmem>>) attributes {dimension_semantics = [#tpu.dimension_semantics<parallel>], iteration_bounds = array<i64: 1>, scalar_prefetch = 0 : i64, scratch_operands = 0 : i64, tpu.core_type = #tpu.core_type<tc>, window_params = [{transform_indices = @transform_0, window_bounds = array<i64: 16, 64>}, {transform_indices = @transform_1, window_bounds = array<i64: 16, 64>}, {pipeline_mode = #tpu.pipeline_mode<synchronous>, transform_indices = @transform_2, window_bounds = array<i64: 64, 64>}, {pipeline_mode = #tpu.pipeline_mode<synchronous>, transform_indices = @transform_3, window_bounds = array<i64: 64, 64>}, {transform_indices = @transform_4, window_bounds = array<i64: 16, 64>}, {transform_indices = @transform_5, window_bounds = array<i64: 16, 64>}]} {
    %c0 = arith.constant 0 : index
    %c0_0 = arith.constant 0 : index
    %0 = vector.load %arg1[%c0, %c0_0] : memref<16x64xbf16, #tpu.memory_space<vmem>>, vector<16x64xbf16>
    %c0_1 = arith.constant 0 : index
    %c0_2 = arith.constant 0 : index
    %1 = vector.load %arg3[%c0_1, %c0_2] : memref<64x64xbf16, #tpu.memory_space<vmem>>, vector<64x64xbf16>
    %cst = arith.constant dense<0.000000e+00> : vector<16x64xf32>
    %2 = tpu.matmul %0, %1, %cst {dimension_numbers = #tpu.dot_dimension_numbers<[1], [0], [0], [1], [0, 0, 1, 1], [], []>} : vector<16x64xbf16>, vector<64x64xbf16>, vector<16x64xf32> -> vector<16x64xf32>
    %3 = arith.truncf %2 : vector<16x64xf32> to vector<16x64xbf16>
    %c0_3 = arith.constant 0 : index
    %c0_4 = arith.constant 0 : index
    %4 = vector.load %arg5[%c0_3, %c0_4] : memref<16x64xbf16, #tpu.memory_space<vmem>>, vector<16x64xbf16>
    tpu.vector_store %arg5[%c0_3, %c0_4], %3 {strides = array<i32>} : memref<16x64xbf16, #tpu.memory_space<vmem>>, vector<16x64xbf16>,
    %c0_5 = arith.constant 0 : index
    %c0_6 = arith.constant 0 : index
    %5 = vector.load %arg2[%c0_5, %c0_6] : memref<16x64xbf16, #tpu.memory_space<vmem>>, vector<16x64xbf16>
    %c0_7 = arith.constant 0 : index
    %c0_8 = arith.constant 0 : index
    %6 = vector.load %arg4[%c0_7, %c0_8] : memref<64x64xbf16, #tpu.memory_space<vmem>>, vector<64x64xbf16>
    %cst_9 = arith.constant dense<0.000000e+00> : vector<16x64xf32>
    %7 = tpu.matmul %5, %6, %cst_9 {dimension_numbers = #tpu.dot_dimension_numbers<[1], [0], [0], [1], [0, 0, 1, 1], [], []>} : vector<16x64xbf16>, vector<64x64xbf16>, vector<16x64xf32> -> vector<16x64xf32>
    %8 = arith.truncf %7 : vector<16x64xf32> to vector<16x64xbf16>
    %c0_10 = arith.constant 0 : index
    %c0_11 = arith.constant 0 : index
    %9 = vector.load %arg6[%c0_10, %c0_11] : memref<16x64xbf16, #tpu.memory_space<vmem>>, vector<16x64xbf16>
    tpu.vector_store %arg6[%c0_10, %c0_11], %8 {strides = array<i32>} : memref<16x64xbf16, #tpu.memory_space<vmem>>, vector<16x64xbf16>,
    return
  }
  func.func @transform_0(%arg0: i32) -> (i32, i32) {
    %c0_i32 = arith.constant 0 : i32
    %c0_i32_0 = arith.constant 0 : i32
    return %arg0, %c0_i32 : i32, i32
  }
  func.func @transform_1(%arg0: i32) -> (i32, i32) {
    %c0_i32 = arith.constant 0 : i32
    %c0_i32_0 = arith.constant 0 : i32
    return %arg0, %c0_i32 : i32, i32
  }
  func.func @transform_2(%arg0: i32) -> (i32, i32) {
    %c0_i32 = arith.constant 0 : i32
    %c0_i32_0 = arith.constant 0 : i32
    %c0_i32_1 = arith.constant 0 : i32
    return %c0_i32, %c0_i32_0 : i32, i32
  }
  func.func @transform_3(%arg0: i32) -> (i32, i32) {
    %c0_i32 = arith.constant 0 : i32
    %c0_i32_0 = arith.constant 0 : i32
    %c0_i32_1 = arith.constant 0 : i32
    return %c0_i32, %c0_i32_0 : i32, i32
  }
  func.func @transform_4(%arg0: i32) -> (i32, i32) {
    %c0_i32 = arith.constant 0 : i32
    %c0_i32_0 = arith.constant 0 : i32
    return %arg0, %c0_i32 : i32, i32
  }
  func.func @transform_5(%arg0: i32) -> (i32, i32) {
    %c0_i32 = arith.constant 0 : i32
    %c0_i32_0 = arith.constant 0 : i32
    return %arg0, %c0_i32 : i32, i32
  }
}

module attributes {stable_mosaic.version = 11 : i64} {
  func.func @kernel(%arg0: i32, %arg1: memref<16x64xbf16, #tpu.memory_space<vmem>>, %arg2: memref<16x64xbf16, #tpu.memory_space<vmem>>, %arg3: memref<16x64xbf16, #tpu.memory_space<vmem>>, %arg4: memref<64x64xbf16, #tpu.memory_space<vmem>>, %arg5: memref<64x16xbf16, #tpu.memory_space<vmem>>) attributes {dimension_semantics = [#tpu.dimension_semantics<parallel>], iteration_bounds = array<i64: 1>, scalar_prefetch = 0 : i64, scratch_operands = 0 : i64, tpu.core_type = #tpu.core_type<tc>, window_params = [{transform_indices = @transform_0, window_bounds = array<i64: 16, 64>}, {pipeline_mode = #tpu.pipeline_mode<synchronous>, transform_indices = @transform_1, window_bounds = array<i64: 16, 64>}, {pipeline_mode = #tpu.pipeline_mode<synchronous>, transform_indices = @transform_2, window_bounds = array<i64: 16, 64>}, {pipeline_mode = #tpu.pipeline_mode<synchronous>, transform_indices = @transform_3, window_bounds = array<i64: 64, 64>}, {transform_indices = @transform_4, window_bounds = array<i64: 64, 16>}]} {
    %c0 = arith.constant 0 : index
    %c0_0 = arith.constant 0 : index
    %0 = vector.load %arg1[%c0, %c0_0] : memref<16x64xbf16, #tpu.memory_space<vmem>>, vector<16x64xbf16>
    %c0_1 = arith.constant 0 : index
    %c0_2 = arith.constant 0 : index
    %1 = vector.load %arg4[%c0_1, %c0_2] : memref<64x64xbf16, #tpu.memory_space<vmem>>, vector<64x64xbf16>
    %cst = arith.constant dense<0.000000e+00> : vector<16x64xf32>
    %2 = tpu.matmul %0, %1, %cst {dimension_numbers = #tpu.dot_dimension_numbers<[1], [0], [0], [1], [0, 0, 1, 1], [], []>} : vector<16x64xbf16>, vector<64x64xbf16>, vector<16x64xf32> -> vector<16x64xf32>
    %3 = vector.extract_strided_slice %2 {offsets = [0, 0], sizes = [16, 8], strides = [1, 1]} : vector<16x64xf32> to vector<16x8xf32>
    %4 = arith.truncf %3 : vector<16x8xf32> to vector<16x8xbf16>
    %c0_3 = arith.constant 0 : index
    %c0_4 = arith.constant 0 : index
    %5 = vector.load %arg2[%c0_3, %c0_4] : memref<16x64xbf16, #tpu.memory_space<vmem>>, vector<16x8xbf16>
    %c0_5 = arith.constant 0 : index
    %c0_6 = arith.constant 0 : index
    %6 = vector.load %arg3[%c0_5, %c0_6] : memref<16x64xbf16, #tpu.memory_space<vmem>>, vector<16x8xbf16>
    %cst_7 = arith.constant dense<0.000000e+00> : vector<16x16xf32>
    %7 = tpu.matmul %4, %5, %cst_7 {dimension_numbers = #tpu.dot_dimension_numbers<[1], [1], [0], [0], [0, 0, 1, 0], [], []>} : vector<16x8xbf16>, vector<16x8xbf16>, vector<16x16xf32> -> vector<16x16xf32>
    %cst_8 = arith.constant dense<0xFF800000> : vector<16xf32>
    %8 = vector.multi_reduction <maximumf>, %7, %cst_8 [1] : vector<16x16xf32> to vector<16xf32>
    %9 = vector.shape_cast %8 : vector<16xf32> to vector<16x1xf32>
    %10 = vector.broadcast %9 : vector<16x1xf32> to vector<16x16xf32>
    %11 = arith.subf %7, %10 : vector<16x16xf32>
    %12 = math.exp %11 : vector<16x16xf32>
    %cst_9 = arith.constant dense<0.000000e+00> : vector<16xf32>
    %13 = vector.multi_reduction <add>, %12, %cst_9 [1] : vector<16x16xf32> to vector<16xf32>
    %14 = vector.shape_cast %13 : vector<16xf32> to vector<16x1xf32>
    %15 = tpu.reciprocal %14 {approx = true} : vector<16x1xf32> -> vector<16x1xf32>
    %16 = vector.broadcast %15 : vector<16x1xf32> to vector<16x16xf32>
    %17 = arith.mulf %12, %16 : vector<16x16xf32>
    %18 = arith.truncf %17 : vector<16x16xf32> to vector<16x16xbf16>
    %cst_10 = arith.constant dense<0.000000e+00> : vector<8x16xf32>
    %19 = tpu.matmul %6, %18, %cst_10 {dimension_numbers = #tpu.dot_dimension_numbers<[0], [1], [1], [0], [0, 1, 1, 0], [], []>} : vector<16x8xbf16>, vector<16x16xbf16>, vector<8x16xf32> -> vector<8x16xf32>
    %20 = arith.truncf %19 : vector<8x16xf32> to vector<8x16xbf16>
    %c0_11 = arith.constant 0 : index
    %c0_12 = arith.constant 0 : index
    %21 = vector.load %arg5[%c0_11, %c0_12] : memref<64x16xbf16, #tpu.memory_space<vmem>>, vector<8x16xbf16>
    tpu.vector_store %arg5[%c0_11, %c0_12], %20 {strides = array<i32>} : memref<64x16xbf16, #tpu.memory_space<vmem>>, vector<8x16xbf16>,
    %22 = vector.extract_strided_slice %2 {offsets = [0, 8], sizes = [16, 8], strides = [1, 1]} : vector<16x64xf32> to vector<16x8xf32>
    %23 = arith.truncf %22 : vector<16x8xf32> to vector<16x8xbf16>
    %c0_13 = arith.constant 0 : index
    %c8 = arith.constant 8 : index
    %24 = vector.load %arg2[%c0_13, %c8] : memref<16x64xbf16, #tpu.memory_space<vmem>>, vector<16x8xbf16>
    %c0_14 = arith.constant 0 : index
    %c8_15 = arith.constant 8 : index
    %25 = vector.load %arg3[%c0_14, %c8_15] : memref<16x64xbf16, #tpu.memory_space<vmem>>, vector<16x8xbf16>
    %cst_16 = arith.constant dense<0.000000e+00> : vector<16x16xf32>
    %26 = tpu.matmul %23, %24, %cst_16 {dimension_numbers = #tpu.dot_dimension_numbers<[1], [1], [0], [0], [0, 0, 1, 0], [], []>} : vector<16x8xbf16>, vector<16x8xbf16>, vector<16x16xf32> -> vector<16x16xf32>
    %cst_17 = arith.constant dense<0xFF800000> : vector<16xf32>
    %27 = vector.multi_reduction <maximumf>, %26, %cst_17 [1] : vector<16x16xf32> to vector<16xf32>
    %28 = vector.shape_cast %27 : vector<16xf32> to vector<16x1xf32>
    %29 = vector.broadcast %28 : vector<16x1xf32> to vector<16x16xf32>
    %30 = arith.subf %26, %29 : vector<16x16xf32>
    %31 = math.exp %30 : vector<16x16xf32>
    %cst_18 = arith.constant dense<0.000000e+00> : vector<16xf32>
    %32 = vector.multi_reduction <add>, %31, %cst_18 [1] : vector<16x16xf32> to vector<16xf32>
    %33 = vector.shape_cast %32 : vector<16xf32> to vector<16x1xf32>
    %34 = tpu.reciprocal %33 {approx = true} : vector<16x1xf32> -> vector<16x1xf32>
    %35 = vector.broadcast %34 : vector<16x1xf32> to vector<16x16xf32>
    %36 = arith.mulf %31, %35 : vector<16x16xf32>
    %37 = arith.truncf %36 : vector<16x16xf32> to vector<16x16xbf16>
    %cst_19 = arith.constant dense<0.000000e+00> : vector<8x16xf32>
    %38 = tpu.matmul %25, %37, %cst_19 {dimension_numbers = #tpu.dot_dimension_numbers<[0], [1], [1], [0], [0, 1, 1, 0], [], []>} : vector<16x8xbf16>, vector<16x16xbf16>, vector<8x16xf32> -> vector<8x16xf32>
    %39 = arith.truncf %38 : vector<8x16xf32> to vector<8x16xbf16>
    %c8_20 = arith.constant 8 : index
    %c0_21 = arith.constant 0 : index
    %40 = vector.load %arg5[%c8_20, %c0_21] : memref<64x16xbf16, #tpu.memory_space<vmem>>, vector<8x16xbf16>
    tpu.vector_store %arg5[%c8_20, %c0_21], %39 {strides = array<i32>} : memref<64x16xbf16, #tpu.memory_space<vmem>>, vector<8x16xbf16>,
    %41 = vector.extract_strided_slice %2 {offsets = [0, 16], sizes = [16, 8], strides = [1, 1]} : vector<16x64xf32> to vector<16x8xf32>
    %42 = arith.truncf %41 : vector<16x8xf32> to vector<16x8xbf16>
    %c0_22 = arith.constant 0 : index
    %c16 = arith.constant 16 : index
    %43 = vector.load %arg2[%c0_22, %c16] : memref<16x64xbf16, #tpu.memory_space<vmem>>, vector<16x8xbf16>
    %c0_23 = arith.constant 0 : index
    %c16_24 = arith.constant 16 : index
    %44 = vector.load %arg3[%c0_23, %c16_24] : memref<16x64xbf16, #tpu.memory_space<vmem>>, vector<16x8xbf16>
    %cst_25 = arith.constant dense<0.000000e+00> : vector<16x16xf32>
    %45 = tpu.matmul %42, %43, %cst_25 {dimension_numbers = #tpu.dot_dimension_numbers<[1], [1], [0], [0], [0, 0, 1, 0], [], []>} : vector<16x8xbf16>, vector<16x8xbf16>, vector<16x16xf32> -> vector<16x16xf32>
    %cst_26 = arith.constant dense<0xFF800000> : vector<16xf32>
    %46 = vector.multi_reduction <maximumf>, %45, %cst_26 [1] : vector<16x16xf32> to vector<16xf32>
    %47 = vector.shape_cast %46 : vector<16xf32> to vector<16x1xf32>
    %48 = vector.broadcast %47 : vector<16x1xf32> to vector<16x16xf32>
    %49 = arith.subf %45, %48 : vector<16x16xf32>
    %50 = math.exp %49 : vector<16x16xf32>
    %cst_27 = arith.constant dense<0.000000e+00> : vector<16xf32>
    %51 = vector.multi_reduction <add>, %50, %cst_27 [1] : vector<16x16xf32> to vector<16xf32>
    %52 = vector.shape_cast %51 : vector<16xf32> to vector<16x1xf32>
    %53 = tpu.reciprocal %52 {approx = true} : vector<16x1xf32> -> vector<16x1xf32>
    %54 = vector.broadcast %53 : vector<16x1xf32> to vector<16x16xf32>
    %55 = arith.mulf %50, %54 : vector<16x16xf32>
    %56 = arith.truncf %55 : vector<16x16xf32> to vector<16x16xbf16>
    %cst_28 = arith.constant dense<0.000000e+00> : vector<8x16xf32>
    %57 = tpu.matmul %44, %56, %cst_28 {dimension_numbers = #tpu.dot_dimension_numbers<[0], [1], [1], [0], [0, 1, 1, 0], [], []>} : vector<16x8xbf16>, vector<16x16xbf16>, vector<8x16xf32> -> vector<8x16xf32>
    %58 = arith.truncf %57 : vector<8x16xf32> to vector<8x16xbf16>
    %c16_29 = arith.constant 16 : index
    %c0_30 = arith.constant 0 : index
    %59 = vector.load %arg5[%c16_29, %c0_30] : memref<64x16xbf16, #tpu.memory_space<vmem>>, vector<8x16xbf16>
    tpu.vector_store %arg5[%c16_29, %c0_30], %58 {strides = array<i32>} : memref<64x16xbf16, #tpu.memory_space<vmem>>, vector<8x16xbf16>,
    %60 = vector.extract_strided_slice %2 {offsets = [0, 24], sizes = [16, 8], strides = [1, 1]} : vector<16x64xf32> to vector<16x8xf32>
    %61 = arith.truncf %60 : vector<16x8xf32> to vector<16x8xbf16>
    %c0_31 = arith.constant 0 : index
    %c24 = arith.constant 24 : index
    %62 = vector.load %arg2[%c0_31, %c24] : memref<16x64xbf16, #tpu.memory_space<vmem>>, vector<16x8xbf16>
    %c0_32 = arith.constant 0 : index
    %c24_33 = arith.constant 24 : index
    %63 = vector.load %arg3[%c0_32, %c24_33] : memref<16x64xbf16, #tpu.memory_space<vmem>>, vector<16x8xbf16>
    %cst_34 = arith.constant dense<0.000000e+00> : vector<16x16xf32>
    %64 = tpu.matmul %61, %62, %cst_34 {dimension_numbers = #tpu.dot_dimension_numbers<[1], [1], [0], [0], [0, 0, 1, 0], [], []>} : vector<16x8xbf16>, vector<16x8xbf16>, vector<16x16xf32> -> vector<16x16xf32>
    %cst_35 = arith.constant dense<0xFF800000> : vector<16xf32>
    %65 = vector.multi_reduction <maximumf>, %64, %cst_35 [1] : vector<16x16xf32> to vector<16xf32>
    %66 = vector.shape_cast %65 : vector<16xf32> to vector<16x1xf32>
    %67 = vector.broadcast %66 : vector<16x1xf32> to vector<16x16xf32>
    %68 = arith.subf %64, %67 : vector<16x16xf32>
    %69 = math.exp %68 : vector<16x16xf32>
    %cst_36 = arith.constant dense<0.000000e+00> : vector<16xf32>
    %70 = vector.multi_reduction <add>, %69, %cst_36 [1] : vector<16x16xf32> to vector<16xf32>
    %71 = vector.shape_cast %70 : vector<16xf32> to vector<16x1xf32>
    %72 = tpu.reciprocal %71 {approx = true} : vector<16x1xf32> -> vector<16x1xf32>
    %73 = vector.broadcast %72 : vector<16x1xf32> to vector<16x16xf32>
    %74 = arith.mulf %69, %73 : vector<16x16xf32>
    %75 = arith.truncf %74 : vector<16x16xf32> to vector<16x16xbf16>
    %cst_37 = arith.constant dense<0.000000e+00> : vector<8x16xf32>
    %76 = tpu.matmul %63, %75, %cst_37 {dimension_numbers = #tpu.dot_dimension_numbers<[0], [1], [1], [0], [0, 1, 1, 0], [], []>} : vector<16x8xbf16>, vector<16x16xbf16>, vector<8x16xf32> -> vector<8x16xf32>
    %77 = arith.truncf %76 : vector<8x16xf32> to vector<8x16xbf16>
    %c24_38 = arith.constant 24 : index
    %c0_39 = arith.constant 0 : index
    %78 = vector.load %arg5[%c24_38, %c0_39] : memref<64x16xbf16, #tpu.memory_space<vmem>>, vector<8x16xbf16>
    tpu.vector_store %arg5[%c24_38, %c0_39], %77 {strides = array<i32>} : memref<64x16xbf16, #tpu.memory_space<vmem>>, vector<8x16xbf16>,
    %79 = vector.extract_strided_slice %2 {offsets = [0, 32], sizes = [16, 8], strides = [1, 1]} : vector<16x64xf32> to vector<16x8xf32>
    %80 = arith.truncf %79 : vector<16x8xf32> to vector<16x8xbf16>
    %c0_40 = arith.constant 0 : index
    %c32 = arith.constant 32 : index
    %81 = vector.load %arg2[%c0_40, %c32] : memref<16x64xbf16, #tpu.memory_space<vmem>>, vector<16x8xbf16>
    %c0_41 = arith.constant 0 : index
    %c32_42 = arith.constant 32 : index
    %82 = vector.load %arg3[%c0_41, %c32_42] : memref<16x64xbf16, #tpu.memory_space<vmem>>, vector<16x8xbf16>
    %cst_43 = arith.constant dense<0.000000e+00> : vector<16x16xf32>
    %83 = tpu.matmul %80, %81, %cst_43 {dimension_numbers = #tpu.dot_dimension_numbers<[1], [1], [0], [0], [0, 0, 1, 0], [], []>} : vector<16x8xbf16>, vector<16x8xbf16>, vector<16x16xf32> -> vector<16x16xf32>
    %cst_44 = arith.constant dense<0xFF800000> : vector<16xf32>
    %84 = vector.multi_reduction <maximumf>, %83, %cst_44 [1] : vector<16x16xf32> to vector<16xf32>
    %85 = vector.shape_cast %84 : vector<16xf32> to vector<16x1xf32>
    %86 = vector.broadcast %85 : vector<16x1xf32> to vector<16x16xf32>
    %87 = arith.subf %83, %86 : vector<16x16xf32>
    %88 = math.exp %87 : vector<16x16xf32>
    %cst_45 = arith.constant dense<0.000000e+00> : vector<16xf32>
    %89 = vector.multi_reduction <add>, %88, %cst_45 [1] : vector<16x16xf32> to vector<16xf32>
    %90 = vector.shape_cast %89 : vector<16xf32> to vector<16x1xf32>
    %91 = tpu.reciprocal %90 {approx = true} : vector<16x1xf32> -> vector<16x1xf32>
    %92 = vector.broadcast %91 : vector<16x1xf32> to vector<16x16xf32>
    %93 = arith.mulf %88, %92 : vector<16x16xf32>
    %94 = arith.truncf %93 : vector<16x16xf32> to vector<16x16xbf16>
    %cst_46 = arith.constant dense<0.000000e+00> : vector<8x16xf32>
    %95 = tpu.matmul %82, %94, %cst_46 {dimension_numbers = #tpu.dot_dimension_numbers<[0], [1], [1], [0], [0, 1, 1, 0], [], []>} : vector<16x8xbf16>, vector<16x16xbf16>, vector<8x16xf32> -> vector<8x16xf32>
    %96 = arith.truncf %95 : vector<8x16xf32> to vector<8x16xbf16>
    %c32_47 = arith.constant 32 : index
    %c0_48 = arith.constant 0 : index
    %97 = vector.load %arg5[%c32_47, %c0_48] : memref<64x16xbf16, #tpu.memory_space<vmem>>, vector<8x16xbf16>
    tpu.vector_store %arg5[%c32_47, %c0_48], %96 {strides = array<i32>} : memref<64x16xbf16, #tpu.memory_space<vmem>>, vector<8x16xbf16>,
    %98 = vector.extract_strided_slice %2 {offsets = [0, 40], sizes = [16, 8], strides = [1, 1]} : vector<16x64xf32> to vector<16x8xf32>
    %99 = arith.truncf %98 : vector<16x8xf32> to vector<16x8xbf16>
    %c0_49 = arith.constant 0 : index
    %c40 = arith.constant 40 : index
    %100 = vector.load %arg2[%c0_49, %c40] : memref<16x64xbf16, #tpu.memory_space<vmem>>, vector<16x8xbf16>
    %c0_50 = arith.constant 0 : index
    %c40_51 = arith.constant 40 : index
    %101 = vector.load %arg3[%c0_50, %c40_51] : memref<16x64xbf16, #tpu.memory_space<vmem>>, vector<16x8xbf16>
    %cst_52 = arith.constant dense<0.000000e+00> : vector<16x16xf32>
    %102 = tpu.matmul %99, %100, %cst_52 {dimension_numbers = #tpu.dot_dimension_numbers<[1], [1], [0], [0], [0, 0, 1, 0], [], []>} : vector<16x8xbf16>, vector<16x8xbf16>, vector<16x16xf32> -> vector<16x16xf32>
    %cst_53 = arith.constant dense<0xFF800000> : vector<16xf32>
    %103 = vector.multi_reduction <maximumf>, %102, %cst_53 [1] : vector<16x16xf32> to vector<16xf32>
    %104 = vector.shape_cast %103 : vector<16xf32> to vector<16x1xf32>
    %105 = vector.broadcast %104 : vector<16x1xf32> to vector<16x16xf32>
    %106 = arith.subf %102, %105 : vector<16x16xf32>
    %107 = math.exp %106 : vector<16x16xf32>
    %cst_54 = arith.constant dense<0.000000e+00> : vector<16xf32>
    %108 = vector.multi_reduction <add>, %107, %cst_54 [1] : vector<16x16xf32> to vector<16xf32>
    %109 = vector.shape_cast %108 : vector<16xf32> to vector<16x1xf32>
    %110 = tpu.reciprocal %109 {approx = true} : vector<16x1xf32> -> vector<16x1xf32>
    %111 = vector.broadcast %110 : vector<16x1xf32> to vector<16x16xf32>
    %112 = arith.mulf %107, %111 : vector<16x16xf32>
    %113 = arith.truncf %112 : vector<16x16xf32> to vector<16x16xbf16>
    %cst_55 = arith.constant dense<0.000000e+00> : vector<8x16xf32>
    %114 = tpu.matmul %101, %113, %cst_55 {dimension_numbers = #tpu.dot_dimension_numbers<[0], [1], [1], [0], [0, 1, 1, 0], [], []>} : vector<16x8xbf16>, vector<16x16xbf16>, vector<8x16xf32> -> vector<8x16xf32>
    %115 = arith.truncf %114 : vector<8x16xf32> to vector<8x16xbf16>
    %c40_56 = arith.constant 40 : index
    %c0_57 = arith.constant 0 : index
    %116 = vector.load %arg5[%c40_56, %c0_57] : memref<64x16xbf16, #tpu.memory_space<vmem>>, vector<8x16xbf16>
    tpu.vector_store %arg5[%c40_56, %c0_57], %115 {strides = array<i32>} : memref<64x16xbf16, #tpu.memory_space<vmem>>, vector<8x16xbf16>,
    %117 = vector.extract_strided_slice %2 {offsets = [0, 48], sizes = [16, 8], strides = [1, 1]} : vector<16x64xf32> to vector<16x8xf32>
    %118 = arith.truncf %117 : vector<16x8xf32> to vector<16x8xbf16>
    %c0_58 = arith.constant 0 : index
    %c48 = arith.constant 48 : index
    %119 = vector.load %arg2[%c0_58, %c48] : memref<16x64xbf16, #tpu.memory_space<vmem>>, vector<16x8xbf16>
    %c0_59 = arith.constant 0 : index
    %c48_60 = arith.constant 48 : index
    %120 = vector.load %arg3[%c0_59, %c48_60] : memref<16x64xbf16, #tpu.memory_space<vmem>>, vector<16x8xbf16>
    %cst_61 = arith.constant dense<0.000000e+00> : vector<16x16xf32>
    %121 = tpu.matmul %118, %119, %cst_61 {dimension_numbers = #tpu.dot_dimension_numbers<[1], [1], [0], [0], [0, 0, 1, 0], [], []>} : vector<16x8xbf16>, vector<16x8xbf16>, vector<16x16xf32> -> vector<16x16xf32>
    %cst_62 = arith.constant dense<0xFF800000> : vector<16xf32>
    %122 = vector.multi_reduction <maximumf>, %121, %cst_62 [1] : vector<16x16xf32> to vector<16xf32>
    %123 = vector.shape_cast %122 : vector<16xf32> to vector<16x1xf32>
    %124 = vector.broadcast %123 : vector<16x1xf32> to vector<16x16xf32>
    %125 = arith.subf %121, %124 : vector<16x16xf32>
    %126 = math.exp %125 : vector<16x16xf32>
    %cst_63 = arith.constant dense<0.000000e+00> : vector<16xf32>
    %127 = vector.multi_reduction <add>, %126, %cst_63 [1] : vector<16x16xf32> to vector<16xf32>
    %128 = vector.shape_cast %127 : vector<16xf32> to vector<16x1xf32>
    %129 = tpu.reciprocal %128 {approx = true} : vector<16x1xf32> -> vector<16x1xf32>
    %130 = vector.broadcast %129 : vector<16x1xf32> to vector<16x16xf32>
    %131 = arith.mulf %126, %130 : vector<16x16xf32>
    %132 = arith.truncf %131 : vector<16x16xf32> to vector<16x16xbf16>
    %cst_64 = arith.constant dense<0.000000e+00> : vector<8x16xf32>
    %133 = tpu.matmul %120, %132, %cst_64 {dimension_numbers = #tpu.dot_dimension_numbers<[0], [1], [1], [0], [0, 1, 1, 0], [], []>} : vector<16x8xbf16>, vector<16x16xbf16>, vector<8x16xf32> -> vector<8x16xf32>
    %134 = arith.truncf %133 : vector<8x16xf32> to vector<8x16xbf16>
    %c48_65 = arith.constant 48 : index
    %c0_66 = arith.constant 0 : index
    %135 = vector.load %arg5[%c48_65, %c0_66] : memref<64x16xbf16, #tpu.memory_space<vmem>>, vector<8x16xbf16>
    tpu.vector_store %arg5[%c48_65, %c0_66], %134 {strides = array<i32>} : memref<64x16xbf16, #tpu.memory_space<vmem>>, vector<8x16xbf16>,
    %136 = vector.extract_strided_slice %2 {offsets = [0, 56], sizes = [16, 8], strides = [1, 1]} : vector<16x64xf32> to vector<16x8xf32>
    %137 = arith.truncf %136 : vector<16x8xf32> to vector<16x8xbf16>
    %c0_67 = arith.constant 0 : index
    %c56 = arith.constant 56 : index
    %138 = vector.load %arg2[%c0_67, %c56] : memref<16x64xbf16, #tpu.memory_space<vmem>>, vector<16x8xbf16>
    %c0_68 = arith.constant 0 : index
    %c56_69 = arith.constant 56 : index
    %139 = vector.load %arg3[%c0_68, %c56_69] : memref<16x64xbf16, #tpu.memory_space<vmem>>, vector<16x8xbf16>
    %cst_70 = arith.constant dense<0.000000e+00> : vector<16x16xf32>
    %140 = tpu.matmul %137, %138, %cst_70 {dimension_numbers = #tpu.dot_dimension_numbers<[1], [1], [0], [0], [0, 0, 1, 0], [], []>} : vector<16x8xbf16>, vector<16x8xbf16>, vector<16x16xf32> -> vector<16x16xf32>
    %cst_71 = arith.constant dense<0xFF800000> : vector<16xf32>
    %141 = vector.multi_reduction <maximumf>, %140, %cst_71 [1] : vector<16x16xf32> to vector<16xf32>
    %142 = vector.shape_cast %141 : vector<16xf32> to vector<16x1xf32>
    %143 = vector.broadcast %142 : vector<16x1xf32> to vector<16x16xf32>
    %144 = arith.subf %140, %143 : vector<16x16xf32>
    %145 = math.exp %144 : vector<16x16xf32>
    %cst_72 = arith.constant dense<0.000000e+00> : vector<16xf32>
    %146 = vector.multi_reduction <add>, %145, %cst_72 [1] : vector<16x16xf32> to vector<16xf32>
    %147 = vector.shape_cast %146 : vector<16xf32> to vector<16x1xf32>
    %148 = tpu.reciprocal %147 {approx = true} : vector<16x1xf32> -> vector<16x1xf32>
    %149 = vector.broadcast %148 : vector<16x1xf32> to vector<16x16xf32>
    %150 = arith.mulf %145, %149 : vector<16x16xf32>
    %151 = arith.truncf %150 : vector<16x16xf32> to vector<16x16xbf16>
    %cst_73 = arith.constant dense<0.000000e+00> : vector<8x16xf32>
    %152 = tpu.matmul %139, %151, %cst_73 {dimension_numbers = #tpu.dot_dimension_numbers<[0], [1], [1], [0], [0, 1, 1, 0], [], []>} : vector<16x8xbf16>, vector<16x16xbf16>, vector<8x16xf32> -> vector<8x16xf32>
    %153 = arith.truncf %152 : vector<8x16xf32> to vector<8x16xbf16>
    %c56_74 = arith.constant 56 : index
    %c0_75 = arith.constant 0 : index
    %154 = vector.load %arg5[%c56_74, %c0_75] : memref<64x16xbf16, #tpu.memory_space<vmem>>, vector<8x16xbf16>
    tpu.vector_store %arg5[%c56_74, %c0_75], %153 {strides = array<i32>} : memref<64x16xbf16, #tpu.memory_space<vmem>>, vector<8x16xbf16>,
    return
  }
  func.func @transform_0(%arg0: i32) -> (i32, i32) {
    %c0_i32 = arith.constant 0 : i32
    %c0_i32_0 = arith.constant 0 : i32
    return %arg0, %c0_i32 : i32, i32
  }
  func.func @transform_1(%arg0: i32) -> (i32, i32) {
    %c0_i32 = arith.constant 0 : i32
    %c0_i32_0 = arith.constant 0 : i32
    %c0_i32_1 = arith.constant 0 : i32
    return %c0_i32, %c0_i32_0 : i32, i32
  }
  func.func @transform_2(%arg0: i32) -> (i32, i32) {
    %c0_i32 = arith.constant 0 : i32
    %c0_i32_0 = arith.constant 0 : i32
    %c0_i32_1 = arith.constant 0 : i32
    return %c0_i32, %c0_i32_0 : i32, i32
  }
  func.func @transform_3(%arg0: i32) -> (i32, i32) {
    %c0_i32 = arith.constant 0 : i32
    %c0_i32_0 = arith.constant 0 : i32
    %c0_i32_1 = arith.constant 0 : i32
    return %c0_i32, %c0_i32_0 : i32, i32
  }
  func.func @transform_4(%arg0: i32) -> (i32, i32) {
    %c0_i32 = arith.constant 0 : i32
    %c0_i32_0 = arith.constant 0 : i32
    return %c0_i32, %arg0 : i32, i32
  }
}

module attributes {stable_mosaic.version = 11 : i64} {
  func.func @_proj_kernel(%arg0: i32, %arg1: memref<16x64xbf16, #tpu.memory_space<vmem>>, %arg2: memref<64x64xbf16, #tpu.memory_space<vmem>>, %arg3: memref<1x64xf32, #tpu.memory_space<vmem>>, %arg4: memref<16x64xf32, #tpu.memory_space<vmem>>) attributes {dimension_semantics = [#tpu.dimension_semantics<parallel>], iteration_bounds = array<i64: 1>, scalar_prefetch = 0 : i64, scratch_operands = 0 : i64, tpu.core_type = #tpu.core_type<tc>, window_params = [{transform_indices = @transform_0, window_bounds = array<i64: 16, 64>}, {pipeline_mode = #tpu.pipeline_mode<synchronous>, transform_indices = @transform_1, window_bounds = array<i64: 64, 64>}, {pipeline_mode = #tpu.pipeline_mode<synchronous>, transform_indices = @transform_2, window_bounds = array<i64: 1, 64>}, {transform_indices = @transform_3, window_bounds = array<i64: 16, 64>}]} {
    %c0 = arith.constant 0 : index
    %c0_0 = arith.constant 0 : index
    %0 = vector.load %arg1[%c0, %c0_0] : memref<16x64xbf16, #tpu.memory_space<vmem>>, vector<16x64xbf16>
    %c0_1 = arith.constant 0 : index
    %c0_2 = arith.constant 0 : index
    %1 = vector.load %arg2[%c0_1, %c0_2] : memref<64x64xbf16, #tpu.memory_space<vmem>>, vector<64x64xbf16>
    %cst = arith.constant dense<0.000000e+00> : vector<16x64xf32>
    %2 = tpu.matmul %0, %1, %cst {dimension_numbers = #tpu.dot_dimension_numbers<[1], [0], [0], [1], [0, 0, 1, 1], [], []>} : vector<16x64xbf16>, vector<64x64xbf16>, vector<16x64xf32> -> vector<16x64xf32>
    %c0_3 = arith.constant 0 : index
    %c0_4 = arith.constant 0 : index
    %3 = vector.load %arg3[%c0_3, %c0_4] : memref<1x64xf32, #tpu.memory_space<vmem>>, vector<1x64xf32>
    %4 = vector.broadcast %3 : vector<1x64xf32> to vector<16x64xf32>
    %5 = arith.addf %2, %4 : vector<16x64xf32>
    %c0_5 = arith.constant 0 : index
    %c0_6 = arith.constant 0 : index
    %6 = vector.load %arg4[%c0_5, %c0_6] : memref<16x64xf32, #tpu.memory_space<vmem>>, vector<16x64xf32>
    tpu.vector_store %arg4[%c0_5, %c0_6], %5 {strides = array<i32>} : memref<16x64xf32, #tpu.memory_space<vmem>>, vector<16x64xf32>,
    return
  }
  func.func @transform_0(%arg0: i32) -> (i32, i32) {
    %c0_i32 = arith.constant 0 : i32
    %c0_i32_0 = arith.constant 0 : i32
    return %arg0, %c0_i32 : i32, i32
  }
  func.func @transform_1(%arg0: i32) -> (i32, i32) {
    %c0_i32 = arith.constant 0 : i32
    %c0_i32_0 = arith.constant 0 : i32
    %c0_i32_1 = arith.constant 0 : i32
    return %c0_i32, %c0_i32_0 : i32, i32
  }
  func.func @transform_2(%arg0: i32) -> (i32, i32) {
    %c0_i32 = arith.constant 0 : i32
    %c0_i32_0 = arith.constant 0 : i32
    %c0_i32_1 = arith.constant 0 : i32
    return %c0_i32, %c0_i32_0 : i32, i32
  }
  func.func @transform_3(%arg0: i32) -> (i32, i32) {
    %c0_i32 = arith.constant 0 : i32
    %c0_i32_0 = arith.constant 0 : i32
    return %arg0, %c0_i32 : i32, i32
  }
}

</mosaic_0001>

<bundles_post_ra>
// kernel: cross_attention_pallas.5
= control target key start
LH: loop header
LB: loop body
LE: loop exit
PB: predicated region body
PF: predicated region fallthrough
CT: control target
= control target key end

     0   :  { %v181_v1 = vmov 0.0   ;;  %vm182_vm0 = vmmov 0   ;;  %s227_s0 = inlined_call_operand.vmem [shape: bf16[16,64], index: 0, kind: input, shape index: {}]   ;;  %s228_s1 = inlined_call_operand.vmem [shape: bf16[64,64], index: 1, kind: input, shape index: {}]   ;;  %s229_s2 = inlined_call_operand.vmem [shape: f32[1,64], index: 2, kind: input, shape index: {}]   ;;  %s230_s3 = inlined_call_operand.hbm [shape: f32[16,64], index: 3, kind: output, shape index: {}]  }
   0x1   :  { %v154_v0 = vld [vmem:[%s228_s1 + $0x18] sm:$0xff]   ;;  %137 = vmatprep.subr.bf16.mxu0 %v181_v1  ;;  %v155_v2 = vld [vmem:[%s228_s1 + $0x10] sm:$0xff]   ;;  %145 = vmatprep.mubr.msk.bf16.mxu0 %vm182_vm0, %v181_v1 }
   0x2   :  { %138 = vmatpush3.bf16.msra.mxu0 %v154_v0 }
   0x3   :  { %139 = vmatprep.subr.bf16.mxu0 %v181_v1 }
   0x4   :  { %8 = vsyncpa [#allocation3], 0  ;;  %v156_v3 = vld [vmem:[%s228_s1 + $0x8] sm:$0xff]   ;;  %v157_v4 = vld [vmem:[%s228_s1] sm:$0xff]   ;;  %vm62_vm1 = vcmask 523264   ;;  %s183_s24 = smov [#allocation2]  }
   0x5   :  { %v158_v5 = vld [vmem:[%s227_s0] sm:$0xff]   ;;  %s114_s25 = sshll.u32 %s183_s24, 4  ;;  %s115_s25 = int_to_ptr.vmem [resolvable:$true] %s114_s25 }
   0x6   :  { %140 = vmatpush3.bf16.msra.mxu0 %v155_v2  ;;  %v125_v6 = vld [vmem:[%s229_s2] ss:$0 sm:$0xff]  ;;  %s159_s1 = scalar_lea.vmem %s115_s25, 256  ;;  %p164_p1 = scmp.lt.s32.totalorder %s115_s25, %s115_s25 }
   0x7   :  { %141 = vmatprep.subr.bf16.mxu0 %v181_v1  ;;  %p160_p0 = scmp.ne.s32.totalorder %s115_s25, %s159_s1  ;;  %p165_p2 = scmp.lt.s32.totalorder %s159_s1, %s159_s1 }
   0x9   :  { %p166_p3 = por %p165_p2, %p164_p1 }
   0xa   :  { %142 = vmatpush3.bf16.msra.mxu0 %v156_v3 }
   0xb   :  { %143 = vmatprep.subr.bf16.mxu0 %v181_v1  ;;  %p167_p4 = pnand %p166_p3, %p160_p0 }
   0xe   :  { %144 = vmatpush3.bf16.msra.mxu0 %v157_v4 }
  0x11   :  { %146 = vmatmul.mubr.msk.bf16.vlgmr.msra.gmra.mxu0 %vm62_vm1, %v158_v5 }
  0xd1   :  { %v100_v7 = vpop.f32.mrf.mxu0 }
  0xd2   :  { %v101_v8 = vadd.f32 %v125_v6, %v100_v7 }
  0xd3   :  { %v147_v9 = vpop.f32.mrf.mxu0 }
  0xd4   :  { %107 = vst.msk [vmem:[#allocation2] sm:$0xff] %vm62_vm1, %v101_v8 }
  0xd5   :  { %v103_v10 = vpop.f32.mrf.mxu0 }
  0xd6   :  { %v104_v11 = vadd.f32 %v125_v6, %v103_v10 }
  0xd7   :  { %v148_v12 = vpop.f32.mrf.mxu0 }
  0xd8   :  { %108 = vst.msk [vmem:[#allocation2 + $0x8] sm:$0xff] %vm62_vm1, %v104_v11 }
  0xd9   :  { %170 = shalt.err (!%p167_p4)
}
  0xda   :  { %s184_s0 = smov 128   ;;  %s185_s2 = smov 8  }
  0xdb   :  { %120 = dma.vmem_to_hbm [thread:$0]  %s115_s25, 256, %s230_s3, [#allocation3], %s184_s0, %s184_s0, %s185_s2  }
  0xdc   :  { %179 = dma.done.wait [#allocation3], 256  }
  0xdd   :  { %180 = vsyncadd [#allocation3], 4294967040 }
  0xde   :  { %124 = vsyncpa [#allocation3], 1 }

// kernel: cross_attention_pallas.3
= control target key start
LH: loop header
LB: loop body
LE: loop exit
PB: predicated region body
PF: predicated region fallthrough
CT: control target
= control target key end

     0   :  { %v282_v0 = vmov 0.0   ;;  %vm283_vm0 = vmmov 0   ;;  %vm59_vm1 = vcmask 523264   ;;  %vm112_vm2 = vcmask 519168   ;;  %s360_s2 = inlined_call_operand.vmem [shape: bf16[64,64], index: 2, kind: input, shape index: {}]   ;;  %s361_s3 = inlined_call_operand.vmem [shape: bf16[64,64], index: 3, kind: input, shape index: {}]   ;;  %s362_s0 = inlined_call_operand.vmem [shape: bf16[16,64], index: 0, kind: input, shape index: {}]   ;;  %s363_s1 = inlined_call_operand.vmem [shape: bf16[16,64], index: 1, kind: input, shape index: {}]   ;;  %s364_s4 = inlined_call_operand.vmem [shape: bf16[16,64], index: 4, kind: output, shape index: {0}]   ;;  %s365_s5 = inlined_call_operand.vmem [shape: bf16[16,64], index: 5, kind: output, shape index: {1}]  }
   0x1   :  { %246 = vmatprep.subr.bf16.mxu0 %v282_v0  ;;  %258 = vmatprep.subr.bf16.mxu1 %v282_v0  ;;  %v272_v1 = vld [vmem:[%s360_s2 + $0x18] sm:$0xff]   ;;  %v274_v3 = vld [vmem:[%s360_s2 + $0x10] sm:$0xff]   ;;  %v276_v5 = vld [vmem:[%s360_s2 + $0x8] sm:$0xff]  }
   0x2   :  { %v273_v2 = vld [vmem:[%s361_s3 + $0x18] sm:$0xff]   ;;  %254 = vmatprep.mubr.msk.bf16.mxu0 %vm283_vm0, %v282_v0  ;;  %266 = vmatprep.mubr.msk.bf16.mxu1 %vm283_vm0, %v282_v0  ;;  %v275_v4 = vld [vmem:[%s361_s3 + $0x10] sm:$0xff]   ;;  %v277_v6 = vld [vmem:[%s361_s3 + $0x8] sm:$0xff]  }
   0x3   :  { %247 = vmatpush3.bf16.msra.mxu0 %v272_v1  ;;  %259 = vmatpush3.bf16.msra.mxu1 %v273_v2  ;;  %v278_v7 = vld [vmem:[%s360_s2] sm:$0xff]  }
   0x4   :  { %248 = vmatprep.subr.bf16.mxu0 %v282_v0  ;;  %260 = vmatprep.subr.bf16.mxu1 %v282_v0  ;;  %v279_v8 = vld [vmem:[%s361_s3] sm:$0xff]  }
   0x5   :  { %v280_v9 = vld [vmem:[%s362_s0] sm:$0xff]  }
   0x6   :  { %v281_v10 = vld [vmem:[%s363_s1] sm:$0xff]  }
   0x7   :  { %249 = vmatpush3.bf16.msra.mxu0 %v274_v3  ;;  %261 = vmatpush3.bf16.msra.mxu1 %v275_v4 }
   0x8   :  { %250 = vmatprep.subr.bf16.mxu0 %v282_v0  ;;  %262 = vmatprep.subr.bf16.mxu1 %v282_v0 }
   0xb   :  { %251 = vmatpush3.bf16.msra.mxu0 %v276_v5  ;;  %263 = vmatpush3.bf16.msra.mxu1 %v277_v6 }
   0xc   :  { %252 = vmatprep.subr.bf16.mxu0 %v282_v0  ;;  %264 = vmatprep.subr.bf16.mxu1 %v282_v0 }
   0xf   :  { %253 = vmatpush3.bf16.msra.mxu0 %v278_v7  ;;  %265 = vmatpush3.bf16.msra.mxu1 %v279_v8 }
  0x12   :  { %255 = vmatmul.mubr.msk.bf16.vlgmr.msra.gmra.mxu0 %vm59_vm1, %v280_v9  ;;  %267 = vmatmul.mubr.msk.bf16.vlgmr.msra.gmra.mxu1 %vm59_vm1, %v281_v10 }
  0xd2   :  { %v97_v11 = vpop.f32.mrf.mxu0  ;;  %v191_v13 = vpop.f32.mrf.mxu1 }
  0xd3   :  { %v232_v12 = vpack.c.bf16 %v97_v11, %v97_v11  ;;  %v234_v14 = vpack.c.bf16 %v191_v13, %v191_v13 }
  0xd4   :  { %v256_v15 = vpop.f32.mrf.mxu0  ;;  %v268_v16 = vpop.f32.mrf.mxu1 }
  0xd5   :  { %113 = vst.msk [vmem:[%s364_s4] sm:$0xf] %vm112_vm2, %v232_v12  ;;  %206 = vst.msk [vmem:[%s365_s5] sm:$0xf] %vm112_vm2, %v234_v14 }
  0xd6   :  { %v100_v17 = vpop.f32.mrf.mxu0  ;;  %v194_v19 = vpop.f32.mrf.mxu1 }
  0xd7   :  { %v233_v18 = vpack.c.bf16 %v100_v17, %v100_v17  ;;  %v235_v20 = vpack.c.bf16 %v194_v19, %v194_v19 }
  0xd8   :  { %v257_v21 = vpop.f32.mrf.mxu0  ;;  %v269_v22 = vpop.f32.mrf.mxu1 }
  0xd9   :  { %114 = vst.msk [vmem:[%s364_s4 + $0x4] sm:$0xf] %vm112_vm2, %v233_v18  ;;  %207 = vst.msk [vmem:[%s365_s5 + $0x4] sm:$0xf] %vm112_vm2, %v235_v20 }

// kernel: cross_attention_pallas.4
= control target key start
LH: loop header
LB: loop body
LE: loop exit
PB: predicated region body
PF: predicated region fallthrough
CT: control target
= control target key end

     0   :  { %v1623_v0 = vmov 0.0   ;;  %vm1624_vm0 = vmmov 0   ;;  %s1625_s23 = smov 120   ;;  %vm57_vm1 = vcmask 523264   ;;  %vm112_vm2 = vcmask 64512   ;;  %s1627_s7 = smov 104   ;;  %s2024_s3 = inlined_call_operand.vmem [shape: bf16[64,64], index: 3, kind: input, shape index: {}]   ;;  %s2025_s1 = inlined_call_operand.vmem [shape: bf16[16,64], index: 1, kind: input, shape index: {}]   ;;  %s2026_s0 = inlined_call_operand.vmem [shape: bf16[16,64], index: 0, kind: input, shape index: {}]   ;;  %s2027_s2 = inlined_call_operand.vmem [shape: bf16[16,64], index: 2, kind: input, shape index: {}]   ;;  %s2028_s4 = inlined_call_operand.vmem [shape: bf16[64,16], index: 4, kind: output, shape index: {}]  }
   0x1   :  { %1420 = vmatprep.subr.bf16.mxu0 %v1623_v0  ;;  %v1538_v1 = vld [vmem:[%s2024_s3 + $0x18] sm:$0xff]   ;;  %1428 = vmatprep.mubr.msk.bf16.mxu0 %vm1624_vm0, %v1623_v0  ;;  %v1539_v2 = vld [vmem:[%s2024_s3 + $0x10] sm:$0xff]   ;;  %v1540_v3 = vld [vmem:[%s2024_s3 + $0x8] sm:$0xff]   ;;  %s1628_s10 = smov 96   ;;  %s1629_s13 = smov 88   ;;  %vm160_vm3 = vcmask 130048  }
   0x2   :  { %1432 = vmatprep.subr.bf16.mxu1 %v1623_v0  ;;  %1434 = vmatprep.mubr.msk.bf16.mxu1 %vm1624_vm0, %v1623_v0  ;;  %v1543_v4 = vld [vmem:[%s2025_s1] sm:$0xff]   ;;  %s1630_s16 = smov 80   ;;  %s1631_s19 = smov 72   ;;  %vm253_vm4 = vcmask 125952  }
   0x3   :  { %1421 = vmatpush3.bf16.msra.mxu0 %v1538_v1  ;;  %267 = vrot.lane.b32.xlu0 %v1543_v4, %s1625_s23  ;;  %v1541_v5 = vld [vmem:[%s2024_s3] sm:$0xff]  }
   0x4   :  { %1422 = vmatprep.subr.bf16.mxu0 %v1623_v0  ;;  %v1542_v6 = vld [vmem:[%s2026_s0] sm:$0xff]   ;;  %s1626_s0 = smov 112  }
   0x5   :  { %v1544_v7 = vld [vmem:[%s2025_s1] sm:$0xff]  }
   0x6   :  { %v117_v8 = vsel %vm112_vm2, %v1544_v7, 0  ;;  %v1545_v9 = vld [vmem:[%s2025_s1] sm:$0xff]  }
   0x7   :  { %1423 = vmatpush3.bf16.msra.mxu0 %v1539_v2  ;;  %1433 = vmatpush3.bf16.xpose.msra.mxu1 %v117_v8  ;;  %v1546_v17 = vld [vmem:[%s2025_s1] sm:$0xff]  }
   0x8   :  { %1424 = vmatprep.subr.bf16.mxu0 %v1623_v0  ;;  %1438 = vmatprep.subr.bf16.mxu1 %v1623_v0  ;;  %v1547_v18 = vld [vmem:[%s2025_s1] sm:$0xff]  }
   0x9   :  { %422 = vrot.lane.b32.xlu1 %v1545_v9, %s1626_s0  ;;  %v1548_v19 = vld [vmem:[%s2025_s1] sm:$0xff]  }
   0xa   :  { %v1549_v20 = vld [vmem:[%s2025_s1] sm:$0xff]  }
   0xb   :  { %1425 = vmatpush3.bf16.msra.mxu0 %v1540_v3  ;;  %v1550_v21 = vld [vmem:[%s2025_s1] sm:$0xff]  }
   0xc   :  { %1426 = vmatprep.subr.bf16.mxu0 %v1623_v0  ;;  %v1551_v22 = vld [vmem:[%s2027_s2] sm:$0xff]  }
   0xd   :  { %v1552_v23 = vld [vmem:[%s2027_s2] sm:$0xff]  }
   0xe   :  { %v1553_v49 = vld [vmem:[%s2027_s2] sm:$0xff]  }
   0xf   :  { %1427 = vmatpush3.bf16.msra.mxu0 %v1541_v5  ;;  %v1554_v5 = vld [vmem:[%s2027_s2] sm:$0xff]  }
  0x10   :  { %1444 = vmatprep.subr.bf16.mxu0 %v1623_v0 }
  0x12   :  { %1429 = vmatmul.mubr.msk.bf16.vlgmr.msra.gmra.mxu0 %vm57_vm1, %v1542_v6 }
  0x13   :  { %1446 = vmatprep.mubr.msk.bf16.mxu0 %vm1624_vm0, %v1623_v0 }
  0x75   :  { %v268_v10 = vpop.permute.xlu0 %267 }
  0x76   :  { %v273_v11 = vsel %vm112_vm2, %v268_v10, 0 }
  0x77   :  { %1445 = vmatpush3.bf16.xpose.msra.mxu0 %v273_v11 }
  0x78   :  { %1456 = vmatprep.subr.bf16.mxu0 %v1623_v0 }
  0x7b   :  { %v423_v24 = vpop.permute.xlu1 %422 }
  0x7c   :  { %v428_v25 = vsel %vm112_vm2, %v423_v24, 0 }
  0xd2   :  { %v95_v12 = vpop.f32.mrf.mxu0 }
  0xd4   :  { %v1430_v13 = vpop.f32.mrf.mxu0 }
  0xd6   :  { %v98_v14 = vpop.f32.mrf.mxu0 }
  0xd7   :  { %v102_v15 = vpack.c.bf16 %v98_v14, %v95_v12 }
  0xd8   :  { %v1431_v16 = vpop.f32.mrf.mxu0 }
  0xd9   :  { %415 = vrot.lane.b32.xlu1 %v102_v15, %s1626_s0  ;;  %260 = vrot.lane.b32.xlu0 %v102_v15, %s1625_s23 }
  0xda   :  { %1435 = vmatmul.mubr.msk.bf16.vlgmr.msra.gmra.mxu1 %vm112_vm2, %v102_v15 }
  0xdb   :  { %1440 = vmatprep.mubr.msk.bf16.mxu1 %vm1624_vm0, %v1623_v0 }
  0xdd   :  { %570 = vrot.lane.b32.xlu1 %v102_v15, %s1627_s7  ;;  %577 = vrot.lane.b32.xlu0 %v1546_v17, %s1627_s7 }
  0xe1   :  { %725 = vrot.lane.b32.xlu1 %v102_v15, %s1628_s10  ;;  %732 = vrot.lane.b32.xlu0 %v1547_v18, %s1628_s10 }
  0xe5   :  { %880 = vrot.lane.b32.xlu1 %v102_v15, %s1629_s13  ;;  %887 = vrot.lane.b32.xlu0 %v1548_v19, %s1629_s13 }
  0xe9   :  { %1035 = vrot.lane.b32.xlu1 %v102_v15, %s1630_s16  ;;  %1042 = vrot.lane.b32.xlu0 %v1549_v20, %s1630_s16 }
  0xed   :  { %1190 = vrot.lane.b32.xlu1 %v102_v15, %s1631_s19  ;;  %1197 = vrot.lane.b32.xlu0 %v1550_v21, %s1631_s19 }
  0xf1   :  { %344 = vrot.lane.b32.xlu1 %v1551_v22, %s1625_s23 }
  0xf5   :  { %654 = vrot.lane.b32.xlu1 %v1552_v23, %s1627_s7 }
 0x14b   :  { %v261_v26 = vpop.permute.xlu0 %260  ;;  %v416_v29 = vpop.permute.xlu1 %415 }
 0x14c   :  { %1447 = vmatmul.mubr.msk.bf16.vlgmr.msra.gmra.mxu0 %vm112_vm2, %v261_v26 }
 0x14d   :  { %1457 = vmatpush3.bf16.xpose.msra.mxu0 %v428_v25  ;;  %1458 = vmatprep.mubr.msk.bf16.mxu0 %vm1624_vm0, %v1623_v0 }
 0x14e   :  { %1468 = vmatprep.subr.bf16.mxu0 %v1623_v0 }
 0x14f   :  { %v578_v27 = vpop.permute.xlu0 %577  ;;  %v571_v32 = vpop.permute.xlu1 %570 }
 0x150   :  { %v583_v28 = vsel %vm112_vm2, %v578_v27, 0 }
 0x153   :  { %v733_v30 = vpop.permute.xlu0 %732  ;;  %v726_v35 = vpop.permute.xlu1 %725 }
 0x154   :  { %1459 = vmatmul.mubr.msk.bf16.vlgmr.msra.gmra.mxu0 %vm112_vm2, %v416_v29  ;;  %v738_v31 = vsel %vm112_vm2, %v733_v30, 0 }
 0x155   :  { %1469 = vmatpush3.bf16.xpose.msra.mxu0 %v583_v28  ;;  %1470 = vmatprep.mubr.msk.bf16.mxu0 %vm1624_vm0, %v1623_v0 }
 0x156   :  { %1480 = vmatprep.subr.bf16.mxu0 %v1623_v0 }
 0x157   :  { %v888_v33 = vpop.permute.xlu0 %887  ;;  %v881_v38 = vpop.permute.xlu1 %880 }
 0x158   :  { %v893_v34 = vsel %vm112_vm2, %v888_v33, 0 }
 0x15b   :  { %v1043_v36 = vpop.permute.xlu0 %1042  ;;  %v1036_v41 = vpop.permute.xlu1 %1035 }
 0x15c   :  { %1471 = vmatmul.mubr.msk.bf16.vlgmr.msra.gmra.mxu0 %vm112_vm2, %v571_v32  ;;  %v1048_v37 = vsel %vm112_vm2, %v1043_v36, 0  ;;  %v1555_v36 = vld [vmem:[%s2027_s2] sm:$0xff]  }
 0x15d   :  { %1481 = vmatpush3.bf16.xpose.msra.mxu0 %v738_v31  ;;  %1482 = vmatprep.mubr.msk.bf16.mxu0 %vm1624_vm0, %v1623_v0 }
 0x15e   :  { %1492 = vmatprep.subr.bf16.mxu0 %v1623_v0 }
 0x15f   :  { %v1198_v39 = vpop.permute.xlu0 %1197  ;;  %v1191_v42 = vpop.permute.xlu1 %1190 }
 0x160   :  { %v1203_v40 = vsel %vm112_vm2, %v1198_v39, 0 }
 0x163   :  { %v1790_v1 = vpop.permute.xlu1 %344 }
 0x164   :  { %1483 = vmatmul.mubr.msk.bf16.vlgmr.msra.gmra.mxu0 %vm112_vm2, %v726_v35 }
 0x165   :  { %1493 = vmatpush3.bf16.xpose.msra.mxu0 %v893_v34  ;;  %1494 = vmatprep.mubr.msk.bf16.mxu0 %vm1624_vm0, %v1623_v0 }
 0x166   :  { %1504 = vmatprep.subr.bf16.mxu0 %v1623_v0 }
 0x167   :  { %v1801_v7 = vpop.permute.xlu1 %654 }
 0x16c   :  { %1495 = vmatmul.mubr.msk.bf16.vlgmr.msra.gmra.mxu0 %vm112_vm2, %v881_v38  ;;  %v1556_v38 = vld [vmem:[%s2027_s2] sm:$0xff]  }
 0x16d   :  { %1505 = vmatpush3.bf16.xpose.msra.mxu0 %v1048_v37  ;;  %1506 = vmatprep.mubr.msk.bf16.mxu0 %vm1624_vm0, %v1623_v0 }
 0x16e   :  { %1516 = vmatprep.subr.bf16.mxu0 %v1623_v0 }
 0x174   :  { %1507 = vmatmul.mubr.msk.bf16.vlgmr.msra.gmra.mxu0 %vm112_vm2, %v1036_v41 }
 0x175   :  { %1517 = vmatpush3.bf16.xpose.msra.mxu0 %v1203_v40  ;;  %1518 = vmatprep.mubr.msk.bf16.mxu0 %vm1624_vm0, %v1623_v0 }
 0x17c   :  { %1519 = vmatmul.mubr.msk.bf16.vlgmr.msra.gmra.mxu0 %vm112_vm2, %v1191_v42 }
 0x19a   :  { %v1764_v43 = vpop.f32.mrf.mxu1 }
 0x19b   :  { %v161_v44 = vsel %vm160_vm3, %v1764_v43, -inf }
 0x19c   :  { %162 = vmax.xlane.f32.xlu0 %v161_v44  ;;  %v1436_v45 = vpop.f32.mrf.mxu1 }
 0x19d   :  { %v1558_v45 = vld [vmem:[%s2027_s2] sm:$0xff]  }
 0x19e   :  { %v156_v46 = vpop.f32.mrf.mxu1 }
 0x19f   :  { %v164_v47 = vsel %vm160_vm3, %v156_v46, -inf }
 0x1a0   :  { %165 = vmax.xlane.f32.xlu1 %v164_v47  ;;  %v1437_v48 = vpop.f32.mrf.mxu1 }
 0x1c9   :  { %190 = vxpose.xlu0.c.b16.start.end [1/1] (short) (narrow) %v1553_v49, 16 }
 0x20c   :  { %v1772_v50 = vpop.f32.mrf.mxu0 }
 0x20d   :  { %v316_v51 = vsel %vm160_vm3, %v1772_v50, -inf }
 0x20e   :  { %317 = vmax.xlane.f32.xlu0 %v316_v51  ;;  %v1448_v52 = vpop.f32.mrf.mxu0 }
 0x210   :  { %v1776_v53 = vpop.f32.mrf.mxu0 }
 0x211   :  { %v319_v54 = vsel %vm160_vm3, %v1776_v53, -inf }
 0x212   :  { %320 = vmax.xlane.f32.xlu0 %v319_v54  ;;  %v1449_v55 = vpop.f32.mrf.mxu0 }
 0x214   :  { %v1780_v56 = vpop.f32.mrf.mxu0 }
 0x215   :  { %v471_v57 = vsel %vm160_vm3, %v1780_v56, -inf }
 0x216   :  { %472 = vmax.xlane.f32.xlu1 %v471_v57  ;;  %v1460_v58 = vpop.f32.mrf.mxu0 }
 0x218   :  { %v1784_v59 = vpop.f32.mrf.mxu0 }
 0x219   :  { %v474_v60 = vsel %vm160_vm3, %v1784_v59, -inf }
 0x21a   :  { %475 = vmax.xlane.f32.xlu0 %v474_v60  ;;  %v1461_v61 = vpop.f32.mrf.mxu0 }
 0x21c   :  { %v1788_v62 = vpop.f32.mrf.mxu0 }
 0x21d   :  { %v626_v34 = vsel %vm160_vm3, %v1788_v62, -inf }
 0x21e   :  { %v1472_v63 = vpop.f32.mrf.mxu0 }
 0x220   :  { %v1792_v2 = vpop.f32.mrf.mxu0 }
 0x221   :  { %v629_v3 = vsel %vm160_vm3, %v1792_v2, -inf }
 0x222   :  { %630 = vmax.xlane.f32.xlu0 %v629_v3  ;;  %v1473_v4 = vpop.f32.mrf.mxu0 }
 0x224   :  { %v1799_v6 = vpop.f32.mrf.mxu0 }
 0x225   :  { %v163_v29 = vpop.xlane.xlu0 %162  ;;  %v781_v35 = vsel %vm160_vm3, %v1799_v6, -inf }
 0x226   :  { %v1484_v8 = vpop.f32.mrf.mxu0  ;;  %v167_v31 = vsub.f32 %v1764_v43, %v163_v29  ;;  %v1557_v43 = vld [vmem:[%s2027_s2] sm:$0xff]  }
 0x227   :  { %809 = vrot.lane.b32.xlu1 %v1554_v5, %s1628_s10 }
 0x228   :  { %v1804_v9 = vpop.f32.mrf.mxu0  ;;  %v169_v33 = vmul.f32 1.442695, %v167_v31 }
 0x229   :  { %v166_v10 = vpop.xlane.xlu1 %165  ;;  %v784_v11 = vsel %vm160_vm3, %v1804_v9, -inf }
 0x22a   :  { %v168_v12 = vsub.f32 %v156_v46, %v166_v10  ;;  %785 = vmax.xlane.f32.xlu0 %v784_v11  ;;  %v1485_v13 = vpop.f32.mrf.mxu0 }
 0x22b   :  { %v1861_v46 = vpop.trf.xlu0 }
 0x22c   :  { %v171_v14 = vmul.f32 1.442695, %v168_v12  ;;  %v1808_v15 = vpop.f32.mrf.mxu0 }
 0x22d   :  { %v936_v37 = vsel %vm160_vm3, %v1808_v15, -inf }
 0x22e   :  { %1559 = vpow2.f32 %v171_v14  ;;  %v1496_v16 = vpop.f32.mrf.mxu0 }
 0x22f   :  { %1561 = vpow2.f32 %v169_v33 }
 0x230   :  { %v1810_v17 = vpop.f32.mrf.mxu0 }
 0x231   :  { %v939_v18 = vsel %vm160_vm3, %v1810_v17, -inf }
 0x232   :  { %940 = vmax.xlane.f32.xlu0 %v939_v18  ;;  %v1497_v19 = vpop.f32.mrf.mxu0 }
 0x234   :  { %v1814_v20 = vpop.f32.mrf.mxu0 }
 0x235   :  { %v1091_v39 = vsel %vm160_vm3, %v1814_v20, -inf }
 0x236   :  { %v1508_v21 = vpop.f32.mrf.mxu0 }
 0x238   :  { %v1816_v22 = vpop.f32.mrf.mxu0 }
 0x239   :  { %v1094_v23 = vsel %vm160_vm3, %v1816_v22, -inf }
 0x23a   :  { %1095 = vmax.xlane.f32.xlu0 %v1094_v23  ;;  %v1509_v24 = vpop.f32.mrf.mxu0 }
 0x23b   :  { %v1820_v25 = vpop.eup %1559 }
 0x23c   :  { %v1822_v26 = vpop.f32.mrf.mxu0  ;;  %v176_v27 = vsel %vm160_vm3, %v1820_v25, 0.0  ;;  %v1844_v40 = vpop.eup %1561 }
 0x23d   :  { %v173_v41 = vsel %vm160_vm3, %v1844_v40, 0.0  ;;  %v1246_v42 = vsel %vm160_vm3, %v1822_v26, -inf }
 0x23e   :  { %177 = vadd.xlane.f32.xlu0 %v176_v27  ;;  %v1520_v28 = vpop.f32.mrf.mxu0 }
 0x240   :  { %v1826_v30 = vpop.f32.mrf.mxu0 }
 0x241   :  { %v1249_v44 = vsel %vm160_vm3, %v1826_v30, -inf }
 0x242   :  { %v1521_v32 = vpop.f32.mrf.mxu0 }
 0x24b   :  { %627 = vmax.xlane.f32.xlu1 %v626_v34 }
 0x24f   :  { %782 = vmax.xlane.f32.xlu1 %v781_v35 }
 0x253   :  { %937 = vmax.xlane.f32.xlu1 %v936_v37 }
 0x254   :  { %499 = vrot.lane.b32.xlu0 %v1555_v36, %s1626_s0 }
 0x257   :  { %1092 = vmax.xlane.f32.xlu1 %v1091_v39 }
 0x258   :  { %964 = vrot.lane.b32.xlu0 %v1556_v38, %s1629_s13 }
 0x25b   :  { %174 = vadd.xlane.f32.xlu1 %v173_v41 }
 0x25f   :  { %1247 = vmax.xlane.f32.xlu1 %v1246_v42 }
 0x270   :  { %1119 = vrot.lane.b32.xlu1 %v1557_v43, %s1630_s16 }
 0x277   :  { %1250 = vmax.xlane.f32.xlu0 %v1249_v44 }
 0x28d   :  { %1274 = vrot.lane.b32.xlu0 %v1558_v45, %s1631_s19 }
 0x297   :  { %v318_v47 = vpop.xlane.xlu0 %317 }
 0x298   :  { %v322_v48 = vsub.f32 %v1772_v50, %v318_v47 }
 0x29a   :  { %v324_v49 = vmul.f32 1.442695, %v322_v48 }
 0x29b   :  { %v321_v51 = vpop.xlane.xlu0 %320 }
 0x29c   :  { %1563 = vpow2.f32 %v324_v49  ;;  %v323_v52 = vsub.f32 %v1776_v53, %v321_v51 }
 0x29e   :  { %v326_v54 = vmul.f32 1.442695, %v323_v52 }
 0x29f   :  { %v473_v55 = vpop.xlane.xlu1 %472 }
 0x2a0   :  { %1565 = vpow2.f32 %v326_v54  ;;  %v477_v57 = vsub.f32 %v1780_v56, %v473_v55 }
 0x2a2   :  { %v479_v58 = vmul.f32 1.442695, %v477_v57 }
 0x2a3   :  { %v476_v60 = vpop.xlane.xlu0 %475  ;;  %v1888_v16 = vpop.permute.xlu1 %809 }
 0x2a4   :  { %1567 = vpow2.f32 %v479_v58  ;;  %v478_v61 = vsub.f32 %v1784_v59, %v476_v60 }
 0x2a6   :  { %v481_v63 = vmul.f32 1.442695, %v478_v61 }
 0x2a8   :  { %1569 = vpow2.f32 %v481_v63 }
 0x2a9   :  { %v1867_v3 = vpop.eup %1563 }
 0x2aa   :  { %v328_v50 = vsel %vm160_vm3, %v1867_v3, 0.0 }
 0x2ab   :  { %v631_v4 = vpop.xlane.xlu0 %630  ;;  %329 = vadd.xlane.f32.xlu1 %v328_v50 }
 0x2ac   :  { %v633_v53 = vsub.f32 %v1792_v2, %v631_v4 }
 0x2ad   :  { %v1872_v5 = vpop.eup %1565 }
 0x2ae   :  { %v636_v8 = vmul.f32 1.442695, %v633_v53  ;;  %v331_v56 = vsel %vm160_vm3, %v1872_v5, 0.0 }
 0x2af   :  { %332 = vadd.xlane.f32.xlu0 %v331_v56 }
 0x2b0   :  { %1571 = vpow2.f32 %v636_v8 }
 0x2b1   :  { %v1876_v59 = vpop.eup %1567 }
 0x2b2   :  { %v483_v10 = vsel %vm160_vm3, %v1876_v59, 0.0 }
 0x2b3   :  { %484 = vadd.xlane.f32.xlu0 %v483_v10  ;;  %v786_v14 = vpop.xlane.xlu0 %785 }
 0x2b4   :  { %v788_v27 = vsub.f32 %v1804_v9, %v786_v14 }
 0x2b5   :  { %v1880_v11 = vpop.eup %1569 }
 0x2b6   :  { %v486_v12 = vsel %vm160_vm3, %v1880_v11, 0.0  ;;  %v791_v34 = vmul.f32 1.442695, %v788_v27 }
 0x2b7   :  { %487 = vadd.xlane.f32.xlu0 %v486_v12 }
 0x2bb   :  { %v941_v18 = vpop.xlane.xlu0 %940 }
 0x2bc   :  { %v943_v19 = vsub.f32 %v1810_v17, %v941_v18 }
 0x2bd   :  { %v1884_v2 = vpop.eup %1571 }
 0x2be   :  { %v641_v13 = vsel %vm160_vm3, %v1884_v2, 0.0  ;;  %v946_v28 = vmul.f32 1.442695, %v943_v19 }
 0x2bf   :  { %642 = vadd.xlane.f32.xlu0 %v641_v13 }
 0x2c3   :  { %v1096_v21 = vpop.xlane.xlu0 %1095 }
 0x2c4   :  { %v1098_v29 = vsub.f32 %v1816_v22, %v1096_v21 }
 0x2c6   :  { %v1101_v35 = vmul.f32 1.442695, %v1098_v29 }
 0x2c7   :  { %v178_v38 = vpop.xlane.xlu0 %177 }
 0x2cb   :  { %v500_v50 = vpop.permute.xlu0 %499 }
 0x2cf   :  { %v965_v12 = vpop.permute.xlu0 %964 }
 0x2d4   :  { %v628_v23 = vpop.xlane.xlu1 %627 }
 0x2d5   :  { %v632_v24 = vsub.f32 %v1788_v62, %v628_v23 }
 0x2d7   :  { %v634_v31 = vmul.f32 1.442695, %v632_v24 }
 0x2d8   :  { %v783_v32 = vpop.xlane.xlu1 %782 }
 0x2d9   :  { %1573 = vpow2.f32 %v634_v31  ;;  %v787_v33 = vsub.f32 %v1799_v6, %v783_v32 }
 0x2da   :  { %1575 = vpow2.f32 %v946_v28 }
 0x2db   :  { %v789_v36 = vmul.f32 1.442695, %v787_v33 }
 0x2dc   :  { %v938_v37 = vpop.xlane.xlu1 %937 }
 0x2dd   :  { %1577 = vpow2.f32 %v789_v36  ;;  %v942_v17 = vsub.f32 %v1808_v15, %v938_v37 }
 0x2de   :  { %1579 = vpow2.f32 %v791_v34 }
 0x2df   :  { %1581 = vpow2.f32 %v1101_v35  ;;  %v944_v62 = vmul.f32 1.442695, %v942_v17 }
 0x2e0   :  { %v1093_v9 = vpop.xlane.xlu1 %1092 }
 0x2e1   :  { %v1097_v22 = vsub.f32 %v1814_v20, %v1093_v9  ;;  %1583 = vpow2.f32 %v944_v62 }
 0x2e2   :  { %1585 = vrcp.f32 %v178_v38 }
 0x2e3   :  { %v1099_v39 = vmul.f32 1.442695, %v1097_v22 }
 0x2e4   :  { %v175_v41 = vpop.xlane.xlu1 %174 }
 0x2e5   :  { %1587 = vrcp.f32 %v175_v41 }
 0x2e6   :  { %v1897_v6 = vpop.eup %1573  ;;  %1589 = vpow2.f32 %v1099_v39 }
 0x2e7   :  { %v638_v42 = vsel %vm160_vm3, %v1897_v6, 0.0  ;;  %v1901_v43 = vpop.eup %1575 }
 0x2e8   :  { %639 = vadd.xlane.f32.xlu1 %v638_v42  ;;  %v1248_v15 = vpop.xlane.xlu1 %1247  ;;  %v951_v48 = vsel %vm160_vm3, %v1901_v43, 0.0 }
 0x2e9   :  { %v1252_v44 = vsub.f32 %v1822_v26, %v1248_v15 }
 0x2ea   :  { %v1904_v45 = vpop.eup %1577 }
 0x2eb   :  { %v1906_v20 = vpop.eup %1579  ;;  %v1254_v47 = vmul.f32 1.442695, %v1252_v44  ;;  %v793_v49 = vsel %vm160_vm3, %v1904_v45, 0.0 }
 0x2ec   :  { %v1912_v51 = vpop.eup %1581  ;;  %952 = vadd.xlane.f32.xlu1 %v951_v48  ;;  %794 = vadd.xlane.f32.xlu0 %v793_v49  ;;  %v796_v26 = vsel %vm160_vm3, %v1906_v20, 0.0  ;;  %v1120_v19 = vpop.permute.xlu1 %1119 }
 0x2ed   :  { %1591 = vpow2.f32 %v1254_v47  ;;  %v1106_v52 = vsel %vm160_vm3, %v1912_v51, 0.0 }
 0x2ee   :  { %v1918_v54 = vpop.eup %1583 }
 0x2ef   :  { %v1586_v55 = vpop.eup %1585  ;;  %v948_v58 = vsel %vm160_vm3, %v1918_v54, 0.0 }
 0x2f0   :  { %1107 = vadd.xlane.f32.xlu1 %v1106_v52  ;;  %797 = vadd.xlane.f32.xlu0 %v796_v26  ;;  %v182_v63 = vmul.f32 %v1586_v55, %v1820_v25 }
 0x2f2   :  { %v1588_v57 = vpop.eup %1587 }
 0x2f3   :  { %v1922_v60 = vpop.eup %1589  ;;  %v181_v61 = vmul.f32 %v1588_v57, %v1844_v40 }
 0x2f4   :  { %949 = vadd.xlane.f32.xlu0 %v948_v58  ;;  %v1103_v53 = vsel %vm160_vm3, %v1922_v60, 0.0 }
 0x2f5   :  { %v183_v4 = vpack.c.bf16 %v182_v63, %v181_v61 }
 0x2f7   :  { %v210_v8 = vsel %vm160_vm3, %v183_v4, 0 }
 0x2f8   :  { %1104 = vadd.xlane.f32.xlu0 %v1103_v53  ;;  %1439 = vmatpush3.bf16.xpose.msra.mxu1 %v210_v8 }
 0x2f9   :  { %1450 = vmatprep.subr.bf16.mxu1 %v1623_v0 }
 0x2fa   :  { %v1929_v56 = vpop.eup %1591 }
 0x2fb   :  { %v1258_v10 = vsel %vm160_vm3, %v1929_v56, 0.0 }
 0x2fc   :  { %1259 = vadd.xlane.f32.xlu0 %v1258_v10 }
 0x2ff   :  { %1441 = vmatmul.mubr.msk.bf16.vlgmr.msra.gmra.mxu1 %vm160_vm3, %v1861_v46 }
 0x300   :  { %v1251_v25 = vpop.xlane.xlu0 %1250  ;;  %1452 = vmatprep.mubr.msk.bf16.mxu1 %vm1624_vm0, %v1623_v0 }
 0x301   :  { %v1253_v40 = vsub.f32 %v1826_v30, %v1251_v25 }
 0x303   :  { %v1256_v13 = vmul.f32 1.442695, %v1253_v40 }
 0x304   :  { %v1275_v46 = vpop.permute.xlu0 %1274 }
 0x305   :  { %1593 = vpow2.f32 %v1256_v13 }
 0x312   :  { %v1939_v14 = vpop.eup %1593 }
 0x313   :  { %v1261_v18 = vsel %vm160_vm3, %v1939_v14, 0.0 }
 0x314   :  { %1262 = vadd.xlane.f32.xlu1 %v1261_v18 }
 0x329   :  { %502 = vxpose.xlu0.c.b16.start.end [1/1] (short) (narrow) %v500_v50, 16 }
 0x32d   :  { %657 = vxpose.xlu0.c.b16.start.end [1/1] (short) (narrow) %v1801_v7, 16 }
 0x331   :  { %812 = vxpose.xlu0.c.b16.start.end [1/1] (short) (narrow) %v1888_v16, 16 }
 0x334   :  { %v330_v21 = vpop.xlane.xlu1 %329 }
 0x335   :  { %967 = vxpose.xlu0.c.b16.start.end [1/1] (short) (narrow) %v965_v12, 16  ;;  %1595 = vrcp.f32 %v330_v21 }
 0x338   :  { %v333_v30 = vpop.xlane.xlu0 %332 }
 0x339   :  { %1597 = vrcp.f32 %v333_v30  ;;  %1122 = vxpose.xlu0.c.b16.start.end [1/1] (short) (narrow) %v1120_v19, 16 }
 0x33c   :  { %v485_v16 = vpop.xlane.xlu0 %484 }
 0x33d   :  { %1277 = vxpose.xlu0.c.b16.start.end [1/1] (short) (narrow) %v1275_v46, 16 }
 0x340   :  { %v488_v31 = vpop.xlane.xlu0 %487 }
 0x341   :  { %347 = vxpose.xlu1.c.b16.start.end [1/1] (short) (narrow) %v1790_v1, 16  ;;  %1599 = vrcp.f32 %v488_v31 }
 0x342   :  { %v1596_v23 = vpop.eup %1595  ;;  %1601 = vrcp.f32 %v485_v16 }
 0x343   :  { %v336_v27 = vmul.f32 %v1596_v23, %v1867_v3 }
 0x346   :  { %v1598_v24 = vpop.eup %1597 }
 0x347   :  { %v337_v28 = vmul.f32 %v1598_v24, %v1872_v5 }
 0x348   :  { %v643_v32 = vpop.xlane.xlu0 %642 }
 0x349   :  { %v338_v7 = vpack.c.bf16 %v337_v28, %v336_v27 }
 0x34b   :  { %v367_v29 = vsel %vm160_vm3, %v338_v7, 0 }
 0x34c   :  { %1451 = vmatpush3.bf16.xpose.msra.mxu1 %v367_v29 }
 0x34d   :  { %1462 = vmatprep.subr.bf16.mxu1 %v1623_v0 }
 0x34e   :  { %v1600_v3 = vpop.eup %1599 }
 0x34f   :  { %v1602_v5 = vpop.eup %1601  ;;  %v492_v17 = vmul.f32 %v1600_v3, %v1880_v11 }
 0x350   :  { %v491_v62 = vmul.f32 %v1602_v5, %v1876_v59 }
 0x352   :  { %v493_v22 = vpack.c.bf16 %v492_v17, %v491_v62 }
 0x354   :  { %v522_v15 = vsel %vm160_vm3, %v493_v22, 0 }
 0x371   :  { %v640_v34 = vpop.xlane.xlu1 %639 }
 0x372   :  { %1603 = vrcp.f32 %v640_v34 }
 0x373   :  { %1605 = vrcp.f32 %v643_v32 }
 0x375   :  { %v795_v33 = vpop.xlane.xlu0 %794  ;;  %v953_v35 = vpop.xlane.xlu1 %952 }
 0x379   :  { %v798_v1 = vpop.xlane.xlu0 %797  ;;  %v1108_v37 = vpop.xlane.xlu1 %1107 }
 0x37a   :  { %1607 = vrcp.f32 %v798_v1 }
 0x37b   :  { %1609 = vrcp.f32 %v795_v33 }
 0x37d   :  { %v950_v36 = vpop.xlane.xlu0 %949 }
 0x37e   :  { %1611 = vrcp.f32 %v950_v36 }
 0x37f   :  { %v1604_v39 = vpop.eup %1603  ;;  %1613 = vrcp.f32 %v953_v35 }
 0x380   :  { %v1606_v41 = vpop.eup %1605  ;;  %v646_v44 = vmul.f32 %v1604_v39, %v1897_v6 }
 0x381   :  { %v1105_v9 = vpop.xlane.xlu0 %1104  ;;  %v647_v59 = vmul.f32 %v1606_v41, %v1884_v2 }
 0x382   :  { %1615 = vrcp.f32 %v1105_v9 }
 0x383   :  { %v648_v11 = vpack.c.bf16 %v647_v59, %v646_v44  ;;  %1617 = vrcp.f32 %v1108_v37 }
 0x385   :  { %v1260_v47 = vpop.xlane.xlu0 %1259  ;;  %v677_v26 = vsel %vm160_vm3, %v648_v11, 0 }
 0x387   :  { %v1608_v48 = vpop.eup %1607 }
 0x388   :  { %v1610_v52 = vpop.eup %1609  ;;  %v802_v6 = vmul.f32 %v1608_v48, %v1906_v20 }
 0x389   :  { %v801_v2 = vmul.f32 %v1610_v52, %v1904_v45 }
 0x38b   :  { %v510_v49 = vpop.trf.xlu0  ;;  %v803_v55 = vpack.c.bf16 %v802_v6, %v801_v2  ;;  %v1612_v57 = vpop.eup %1611 }
 0x38c   :  { %v1614_v61 = vpop.eup %1613  ;;  %v956_v20 = vmul.f32 %v1612_v57, %v1918_v54 }
 0x38d   :  { %v832_v63 = vsel %vm160_vm3, %v803_v55, 0  ;;  %v957_v45 = vmul.f32 %v1614_v61, %v1901_v43 }
 0x38f   :  { %v665_v58 = vpop.trf.xlu0  ;;  %v958_v50 = vpack.c.bf16 %v957_v45, %v956_v20  ;;  %v1616_v4 = vpop.eup %1615 }
 0x390   :  { %v1618_v8 = vpop.eup %1617  ;;  %v1111_v12 = vmul.f32 %v1616_v4, %v1922_v60 }
 0x391   :  { %v987_v10 = vsel %vm160_vm3, %v958_v50, 0  ;;  %v1112_v54 = vmul.f32 %v1618_v8, %v1912_v51 }
 0x393   :  { %v820_v53 = vpop.trf.xlu0  ;;  %v1113_v43 = vpack.c.bf16 %v1112_v54, %v1111_v12 }
 0x395   :  { %v1142_v21 = vsel %vm160_vm3, %v1113_v43, 0 }
 0x397   :  { %v975_v18 = vpop.trf.xlu0 }
 0x39b   :  { %v1130_v27 = vpop.trf.xlu0 }
 0x39d   :  { %v1263_v38 = vpop.xlane.xlu1 %1262 }
 0x39e   :  { %1619 = vrcp.f32 %v1263_v38 }
 0x39f   :  { %1621 = vrcp.f32 %v1260_v47 }
 0x3a3   :  { %v355_v42 = vpop.trf.xlu1 }
 0x3a4   :  { %1453 = vmatmul.mubr.msk.bf16.vlgmr.msra.gmra.mxu1 %vm160_vm3, %v355_v42 }
 0x3a5   :  { %1463 = vmatpush3.bf16.xpose.msra.mxu1 %v522_v15  ;;  %1464 = vmatprep.mubr.msk.bf16.mxu1 %vm1624_vm0, %v1623_v0 }
 0x3a6   :  { %1474 = vmatprep.subr.bf16.mxu1 %v1623_v0 }
 0x3ab   :  { %v1620_v40 = vpop.eup %1619 }
 0x3ac   :  { %1465 = vmatmul.mubr.msk.bf16.vlgmr.msra.gmra.mxu1 %vm160_vm3, %v510_v49  ;;  %v1622_v46 = vpop.eup %1621  ;;  %v1267_v51 = vmul.f32 %v1620_v40, %v1939_v14  ;;  %v1285_v14 = vpop.trf.xlu0 }
 0x3ad   :  { %1475 = vmatpush3.bf16.xpose.msra.mxu1 %v677_v26  ;;  %1476 = vmatprep.mubr.msk.bf16.mxu1 %vm1624_vm0, %v1623_v0  ;;  %v1266_v23 = vmul.f32 %v1622_v46, %v1929_v56 }
 0x3ae   :  { %1486 = vmatprep.subr.bf16.mxu1 %v1623_v0 }
 0x3af   :  { %v1268_v24 = vpack.c.bf16 %v1267_v51, %v1266_v23 }
 0x3b1   :  { %v1297_v28 = vsel %vm160_vm3, %v1268_v24, 0 }
 0x3b4   :  { %1477 = vmatmul.mubr.msk.bf16.vlgmr.msra.gmra.mxu1 %vm160_vm3, %v665_v58 }
 0x3b5   :  { %1487 = vmatpush3.bf16.xpose.msra.mxu1 %v832_v63  ;;  %1488 = vmatprep.mubr.msk.bf16.mxu1 %vm1624_vm0, %v1623_v0 }
 0x3b6   :  { %1498 = vmatprep.subr.bf16.mxu1 %v1623_v0 }
 0x3bc   :  { %1489 = vmatmul.mubr.msk.bf16.vlgmr.msra.gmra.mxu1 %vm160_vm3, %v820_v53 }
 0x3bd   :  { %1499 = vmatpush3.bf16.xpose.msra.mxu1 %v987_v10  ;;  %1500 = vmatprep.mubr.msk.bf16.mxu1 %vm1624_vm0, %v1623_v0 }
 0x3be   :  { %1510 = vmatprep.subr.bf16.mxu1 %v1623_v0 }
 0x3bf   :  { %v246_v25 = vpop.f32.mrf.mxu1 }
 0x3c0   :  { %v252_v13 = vpack.c.bf16 %v246_v25, %v246_v25 }
 0x3c1   :  { %v1442_v19 = vpop.f32.mrf.mxu1 }
 0x3c2   :  { %254 = vst.msk [vmem:[%s2028_s4] sm:$0xf] %vm253_vm4, %v252_v13 }
 0x3c3   :  { %v249_v60 = vpop.f32.mrf.mxu1 }
 0x3c4   :  { %1501 = vmatmul.mubr.msk.bf16.vlgmr.msra.gmra.mxu1 %vm160_vm3, %v975_v18 }
 0x3c5   :  { %1511 = vmatpush3.bf16.xpose.msra.mxu1 %v1142_v21  ;;  %1512 = vmatprep.mubr.msk.bf16.mxu1 %vm1624_vm0, %v1623_v0  ;;  %v1443_v30 = vpop.f32.mrf.mxu1 }
 0x3c6   :  { %1522 = vmatprep.subr.bf16.mxu1 %v1623_v0 }
 0x3cc   :  { %1513 = vmatmul.mubr.msk.bf16.vlgmr.msra.gmra.mxu1 %vm160_vm3, %v1130_v27 }
 0x3cd   :  { %1523 = vmatpush3.bf16.xpose.msra.mxu1 %v1297_v28  ;;  %1524 = vmatprep.mubr.msk.bf16.mxu1 %vm1624_vm0, %v1623_v0 }
 0x3d4   :  { %1525 = vmatmul.mubr.msk.bf16.vlgmr.msra.gmra.mxu1 %vm160_vm3, %v1285_v14 }
 0x464   :  { %v403_v7 = vpop.f32.mrf.mxu1 }
 0x465   :  { %v409_v29 = vpack.c.bf16 %v403_v7, %v403_v7 }
 0x466   :  { %v1454_v16 = vpop.f32.mrf.mxu1 }
 0x467   :  { %410 = vst.msk [vmem:[%s2028_s4 + $0x4] sm:$0xf] %vm253_vm4, %v409_v29 }
 0x468   :  { %v406_v56 = vpop.f32.mrf.mxu1 }
 0x46a   :  { %v1455_v31 = vpop.f32.mrf.mxu1 }
 0x46c   :  { %v558_v32 = vpop.f32.mrf.mxu1 }
 0x46d   :  { %v564_v33 = vpack.c.bf16 %v558_v32, %v558_v32 }
 0x46e   :  { %v1466_v34 = vpop.f32.mrf.mxu1 }
 0x46f   :  { %565 = vst.msk [vmem:[%s2028_s4 + $0x8] sm:$0xf] %vm253_vm4, %v564_v33 }
 0x470   :  { %v561_v0 = vpop.f32.mrf.mxu1 }
 0x472   :  { %v1467_v1 = vpop.f32.mrf.mxu1 }
 0x474   :  { %v713_v35 = vpop.f32.mrf.mxu1 }
 0x475   :  { %v719_v3 = vpack.c.bf16 %v713_v35, %v713_v35 }
 0x476   :  { %v1478_v36 = vpop.f32.mrf.mxu1 }
 0x477   :  { %720 = vst.msk [vmem:[%s2028_s4 + $0xc] sm:$0xf] %vm253_vm4, %v719_v3 }
 0x478   :  { %v716_v5 = vpop.f32.mrf.mxu1 }
 0x47a   :  { %v1479_v37 = vpop.f32.mrf.mxu1 }
 0x47c   :  { %v868_v17 = vpop.f32.mrf.mxu1 }
 0x47d   :  { %v874_v62 = vpack.c.bf16 %v868_v17, %v868_v17 }
 0x47e   :  { %v1490_v9 = vpop.f32.mrf.mxu1 }
 0x47f   :  { %875 = vst.msk [vmem:[%s2028_s4 + $0x10] sm:$0xf] %vm253_vm4, %v874_v62 }
 0x480   :  { %v871_v38 = vpop.f32.mrf.mxu1 }
 0x482   :  { %v1491_v22 = vpop.f32.mrf.mxu1 }
 0x484   :  { %v1023_v39 = vpop.f32.mrf.mxu1 }
 0x485   :  { %v1029_v41 = vpack.c.bf16 %v1023_v39, %v1023_v39 }
 0x486   :  { %v1502_v42 = vpop.f32.mrf.mxu1 }
 0x487   :  { %1030 = vst.msk [vmem:[%s2028_s4 + $0x14] sm:$0xf] %vm253_vm4, %v1029_v41 }
 0x488   :  { %v1026_v15 = vpop.f32.mrf.mxu1 }
 0x48a   :  { %v1503_v44 = vpop.f32.mrf.mxu1 }
 0x48c   :  { %v1178_v47 = vpop.f32.mrf.mxu1 }
 0x48d   :  { %v1184_v59 = vpack.c.bf16 %v1178_v47, %v1178_v47 }
 0x48e   :  { %v1514_v11 = vpop.f32.mrf.mxu1 }
 0x48f   :  { %1185 = vst.msk [vmem:[%s2028_s4 + $0x18] sm:$0xf] %vm253_vm4, %v1184_v59 }
 0x490   :  { %v1181_v48 = vpop.f32.mrf.mxu1 }
 0x492   :  { %v1515_v49 = vpop.f32.mrf.mxu1 }
 0x494   :  { %v1333_v52 = vpop.f32.mrf.mxu1 }
 0x495   :  { %v1339_v26 = vpack.c.bf16 %v1333_v52, %v1333_v52 }
 0x496   :  { %v1526_v6 = vpop.f32.mrf.mxu1 }
 0x497   :  { %1340 = vst.msk [vmem:[%s2028_s4 + $0x1c] sm:$0xf] %vm253_vm4, %v1339_v26 }
 0x498   :  { %v1336_v2 = vpop.f32.mrf.mxu1 }
 0x49a   :  { %v1527_v55 = vpop.f32.mrf.mxu1 }

</bundles_post_ra>
